<compile_context>
chip_gen: v6e
topology: v6e:2x2x1
jax: 0.10.0
libtpu: 0.0.40
codegen_flags: <defaults>
</compile_context>

<pallas_src>
import jax
import jax.numpy as jnp
from jax.experimental import pallas as pl
from jax.experimental.pallas import tpu as pltpu

INPUT_DIM = 15
NUM_CLASSES = 10


def _round_up(x, m):
    return (x + m - 1) // m * m


def lstm_fc_kernel(x_ref, w_ih_ref, w_hh_ref, b_ref, w_fc_ref, b_fc_ref,
                   out_ref, h_ref, c_ref, xg_ref, hs_ref):
    """One grid step = one (batch block, time chunk) of the recurrence."""
    TT, BB, D = x_ref.shape          # time chunk, batch block, input features
    Hp = h_ref.shape[-1]             # hidden size padded to a multiple of 128

    # New batch block starts -> reset the recurrent state.
    @pl.when(pl.program_id(1) == 0)
    def _init_state():
        h_ref[...] = jnp.zeros_like(h_ref)
        c_ref[...] = jnp.zeros_like(c_ref)

    # ---- hoisted per-chunk work (outside the serial recurrence) -------------
    # Input projection + LSTM bias for all TT timesteps in one matmul
    # (replaces TT tiny matmuls and TT bias broadcasts inside the loop).
    x = x_ref[...].astype(jnp.float32).reshape(TT * BB, D)
    xg = jnp.dot(x, w_ih_ref[...], preferred_element_type=jnp.float32) + b_ref[...]
    xg_ref[...] = xg.reshape(TT, BB, 4 * Hp)
    w_hh = w_hh_ref[...]             # (Hp, 4Hp), loaded once per chunk

    # ---- serial LSTM recurrence over the TT timesteps of this chunk ---------
    def step(t, carry):
        h, c = carry
        gates = xg_ref[t] + jnp.dot(h, w_hh, preferred_element_type=jnp.float32)
        # Static, 128-lane-aligned gate slices (PyTorch gate order i, f, g, o).
        i_g = jax.nn.sigmoid(gates[:, 0 * Hp:1 * Hp])
        f_g = jax.nn.sigmoid(gates[:, 1 * Hp:2 * Hp])
        g_g = jnp.tanh(gates[:, 2 * Hp:3 * Hp])
        o_g = jax.nn.sigmoid(gates[:, 3 * Hp:4 * Hp])
        c_new = f_g * c + i_g * g_g
        h_new = o_g * jnp.tanh(c_new)
        hs_ref[t] = h_new            # stash h_t for the hoisted FC matmul
        return h_new, c_new

    h_fin, c_fin = jax.lax.fori_loop(0, TT, step, (h_ref[...], c_ref[...]),
                                     unroll=True)
    h_ref[...] = h_fin
    c_ref[...] = c_fin

    # ---- FC head hoisted out of the recurrence: one matmul per chunk --------
    hs = hs_ref[...].reshape(TT * BB, Hp)
    logits = (jnp.dot(hs, w_fc_ref[...], preferred_element_type=jnp.float32)
              + b_fc_ref[...])
    out_ref[...] = logits.reshape(TT, BB, -1).astype(out_ref.dtype)


def lstm_classifier_forward(x, params, *, time_block=None):
    """x: (B, T, INPUT_DIM) float32 -> logits (B, T, NUM_CLASSES) float32."""
    B, T, D = x.shape
    H = params["w_hh"].shape[0]
    Hp = _round_up(H, 128)                 # lane-aligned gate slices
    NCp = _round_up(NUM_CLASSES, 128)      # lane-dense output stores

    # ---- repack weights once (outside the kernel): gate g lives at columns
    # [g*Hp, g*Hp + H); padded rows/cols are zero so padded h/c lanes stay 0.
    def pad_gate_cols(w):                  # (K, 4H) -> (K, 4Hp)
        K = w.shape[0]
        w4 = w.reshape(K, 4, H)
        return jnp.pad(w4, ((0, 0), (0, 0), (0, Hp - H))).reshape(K, 4 * Hp)

    w_ih_p = pad_gate_cols(params["w_ih"]).astype(jnp.float32)          # (D, 4Hp)
    w_hh_p = jnp.pad(pad_gate_cols(params["w_hh"]),
                     ((0, Hp - H), (0, 0))).astype(jnp.float32)         # (Hp, 4Hp)
    b_comb = (params["b_ih"] + params["b_hh"]).reshape(4, H)
    b_p = jnp.pad(b_comb, ((0, 0), (0, Hp - H))).reshape(1, 4 * Hp)     # (1, 4Hp)
    w_fc_p = jnp.pad(params["w_fc"],
                     ((0, Hp - H), (0, NCp - NUM_CLASSES)))             # (Hp, NCp)
    b_fc_p = jnp.pad(params["b_fc"], (0, NCp - NUM_CLASSES)).reshape(1, NCp)
    # TODO(synk): for large H on v6e/v7x, cast weights/x to bfloat16 (keep f32
    # accumulation and f32 h/c scratch) to halve VMEM/HBM traffic.

    # ---- time chunking: amortize per-grid-step overhead over TT timesteps ---
    TT = time_block if time_block is not None else min(16, _round_up(T, 8))
    T_pad = _round_up(T, TT)

    # ---- optional batch split (parallel grid axis -> v7x megacore); only when
    # the resulting batch block stays sublane-clean (multiple of 8).
    nb = 2 if (B % 2 == 0 and (B // 2) % 8 == 0) else 1
    BB = B // nb

    x_tm = jnp.transpose(x, (1, 0, 2)).astype(jnp.float32)    # (T, B, D)
    if T_pad != T:
        x_tm = jnp.pad(x_tm, ((0, T_pad - T), (0, 0), (0, 0)))

    out_tm = pl.pallas_call(
        lstm_fc_kernel,
        out_shape=jax.ShapeDtypeStruct((T_pad, B, NCp), jnp.float32),
        grid_spec=pltpu.PrefetchScalarGridSpec(
            num_scalar_prefetch=0,
            grid=(nb, T_pad // TT),
            in_specs=[
                pl.BlockSpec((TT, BB, D), lambda b, t: (t, b, 0)),   # x chunk
                pl.BlockSpec((D, 4 * Hp), lambda b, t: (0, 0)),      # W_ih^T (gate-padded)
                pl.BlockSpec((Hp, 4 * Hp), lambda b, t: (0, 0)),     # W_hh^T (gate-padded)
                pl.BlockSpec((1, 4 * Hp), lambda b, t: (0, 0)),      # b_ih + b_hh
                pl.BlockSpec((Hp, NCp), lambda b, t: (0, 0)),        # W_fc^T (padded)
                pl.BlockSpec((1, NCp), lambda b, t: (0, 0)),         # b_fc (padded)
            ],
            out_specs=pl.BlockSpec((TT, BB, NCp), lambda b, t: (t, b, 0)),
            scratch_shapes=[
                pltpu.VMEM((BB, Hp), jnp.float32),           # h carry across chunks
                pltpu.VMEM((BB, Hp), jnp.float32),           # c carry across chunks
                pltpu.VMEM((TT, BB, 4 * Hp), jnp.float32),   # per-chunk x-projection
                pltpu.VMEM((TT, BB, Hp), jnp.float32),       # per-chunk h history
            ],
        ),
        compiler_params=pltpu.CompilerParams(
            dimension_semantics=("parallel", "arbitrary")),  # batch || , time serial
    )(x_tm, w_ih_p, w_hh_p, b_p, w_fc_p, b_fc_p)

    out = jnp.transpose(out_tm, (1, 0, 2))                   # (B, T_pad, NCp)
    return out[:, :T, :NUM_CLASSES]


def init_params(key, hidden_size):
    """Deterministic synthetic init; shapes match nn.LSTM / nn.Linear (transposed for x @ W)."""
    H = hidden_size
    k = 1.0 / jnp.sqrt(jnp.float32(H))
    ks = jax.random.split(key, 6)
    u = lambda kk, shape: jax.random.uniform(kk, shape, jnp.float32, -k, k)
    return {
        "w_ih": u(ks[0], (INPUT_DIM, 4 * H)),   # = weight_ih_l0.T, gate order i,f,g,o
        "w_hh": u(ks[1], (H, 4 * H)),           # = weight_hh_l0.T
        "b_ih": u(ks[2], (4 * H,)),
        "b_hh": u(ks[3], (4 * H,)),
        "w_fc": u(ks[4], (H, NUM_CLASSES)),     # = fc.weight.T
        "b_fc": u(ks[5], (NUM_CLASSES,)),
    }


def reference_forward(x, params):
    """Pure-JAX reference (lax.scan) with identical semantics, for verification."""
    B, T, D = x.shape
    H = params["w_hh"].shape[0]
    b = params["b_ih"] + params["b_hh"]

    def step(carry, x_t):
        h, c = carry
        gates = x_t @ params["w_ih"] + h @ params["w_hh"] + b
        i_g = jax.nn.sigmoid(gates[:, 0:H])
        f_g = jax.nn.sigmoid(gates[:, H:2 * H])
        g_g = jnp.tanh(gates[:, 2 * H:3 * H])
        o_g = jax.nn.sigmoid(gates[:, 3 * H:4 * H])
        c_new = f_g * c + i_g * g_g
        h_new = o_g * jnp.tanh(c_new)
        return (h_new, c_new), h_new

    h0 = jnp.zeros((B, H), jnp.float32)
    c0 = jnp.zeros((B, H), jnp.float32)
    _, hs = jax.lax.scan(step, (h0, c0), jnp.transpose(x, (1, 0, 2)))
    out = jnp.transpose(hs, (1, 0, 2))          # (B, T, H)
    return out @ params["w_fc"] + params["b_fc"]


if __name__ == "__main__":
    B, T, H = 2, 8, 32
    key = jax.random.PRNGKey(0)
    k_x, k_p = jax.random.split(key)

    x = jax.random.normal(k_x, (B, T, INPUT_DIM), jnp.float32)
    params = init_params(k_p, H)

    logits = lstm_classifier_forward(x, params)
    logits = jax.block_until_ready(logits)

    ref = reference_forward(x, params)
    assert logits.shape == (B, T, NUM_CLASSES)
    assert jnp.allclose(logits, ref, atol=1e-4, rtol=1e-4), "mismatch vs JAX reference"

    print("KERNEL_OK")
</pallas_src>

<mosaic_0001>
module attributes {stable_mosaic.version = 11 : i64} {
  func.func @lstm_fc_kernel(%arg0: i32, %arg1: i32, %arg2: memref<8x2x15xf32, #tpu.memory_space<vmem>>, %arg3: memref<15x512xf32, #tpu.memory_space<vmem>>, %arg4: memref<128x512xf32, #tpu.memory_space<vmem>>, %arg5: memref<1x512xf32, #tpu.memory_space<vmem>>, %arg6: memref<128x128xf32, #tpu.memory_space<vmem>>, %arg7: memref<1x128xf32, #tpu.memory_space<vmem>>, %arg8: memref<8x2x128xf32, #tpu.memory_space<vmem>>, %arg9: memref<2x128xf32, #tpu.memory_space<vmem>>, %arg10: memref<2x128xf32, #tpu.memory_space<vmem>>, %arg11: memref<8x2x512xf32, #tpu.memory_space<vmem>>, %arg12: memref<8x2x128xf32, #tpu.memory_space<vmem>>) attributes {dimension_semantics = [#tpu.dimension_semantics<parallel>, #tpu.dimension_semantics<arbitrary>], iteration_bounds = array<i64: 1, 1>, scalar_prefetch = 0 : i64, scratch_operands = 4 : i64, tpu.core_type = #tpu.core_type<tc>, window_params = [{transform_indices = @transform_0, window_bounds = array<i64: 8, 2, 15>}, {pipeline_mode = #tpu.pipeline_mode<synchronous>, transform_indices = @transform_1, window_bounds = array<i64: 15, 512>}, {pipeline_mode = #tpu.pipeline_mode<synchronous>, transform_indices = @transform_2, window_bounds = array<i64: 128, 512>}, {pipeline_mode = #tpu.pipeline_mode<synchronous>, transform_indices = @transform_3, window_bounds = array<i64: 1, 512>}, {pipeline_mode = #tpu.pipeline_mode<synchronous>, transform_indices = @transform_4, window_bounds = array<i64: 128, 128>}, {pipeline_mode = #tpu.pipeline_mode<synchronous>, transform_indices = @transform_5, window_bounds = array<i64: 1, 128>}, {transform_indices = @transform_6, window_bounds = array<i64: 8, 2, 128>}]} {
    %c0_i32 = arith.constant 0 : i32
    %0 = arith.cmpi eq, %arg1, %c0_i32 : i32
    %1 = arith.extui %0 : i1 to i32
    %c0_i32_0 = arith.constant 0 : i32
    %2 = arith.cmpi ne, %1, %c0_i32_0 : i32
    scf.if %2 {
      %cst_96 = arith.constant 0.000000e+00 : f32
      %298 = vector.broadcast %cst_96 : f32 to vector<2x128xf32>
      %c0_97 = arith.constant 0 : index
      %c0_98 = arith.constant 0 : index
      %299 = vector.load %arg9[%c0_97, %c0_98] : memref<2x128xf32, #tpu.memory_space<vmem>>, vector<2x128xf32>
      tpu.vector_store %arg9[%c0_97, %c0_98], %298 {strides = array<i32>} : memref<2x128xf32, #tpu.memory_space<vmem>>, vector<2x128xf32>,
      %cst_99 = arith.constant 0.000000e+00 : f32
      %300 = vector.broadcast %cst_99 : f32 to vector<2x128xf32>
      %c0_100 = arith.constant 0 : index
      %c0_101 = arith.constant 0 : index
      %301 = vector.load %arg10[%c0_100, %c0_101] : memref<2x128xf32, #tpu.memory_space<vmem>>, vector<2x128xf32>
      tpu.vector_store %arg10[%c0_100, %c0_101], %300 {strides = array<i32>} : memref<2x128xf32, #tpu.memory_space<vmem>>, vector<2x128xf32>,
    } else {
    }
    %c0 = arith.constant 0 : index
    %c0_1 = arith.constant 0 : index
    %c0_2 = arith.constant 0 : index
    %3 = vector.load %arg2[%c0, %c0_1, %c0_2] : memref<8x2x15xf32, #tpu.memory_space<vmem>>, vector<8x2x15xf32>
    %4 = vector.shape_cast %3 : vector<8x2x15xf32> to vector<16x15xf32>
    %c0_3 = arith.constant 0 : index
    %c0_4 = arith.constant 0 : index
    %5 = vector.load %arg3[%c0_3, %c0_4] : memref<15x512xf32, #tpu.memory_space<vmem>>, vector<15x512xf32>
    %cst = arith.constant dense<0.000000e+00> : vector<16x512xf32>
    %6 = tpu.matmul %4, %5, %cst {dimension_numbers = #tpu.dot_dimension_numbers<[1], [0], [0], [1], [0, 0, 1, 1], [], []>} : vector<16x15xf32>, vector<15x512xf32>, vector<16x512xf32> -> vector<16x512xf32>
    %c0_5 = arith.constant 0 : index
    %c0_6 = arith.constant 0 : index
    %7 = vector.load %arg5[%c0_5, %c0_6] : memref<1x512xf32, #tpu.memory_space<vmem>>, vector<1x512xf32>
    %8 = vector.broadcast %7 : vector<1x512xf32> to vector<16x512xf32>
    %9 = arith.addf %6, %8 : vector<16x512xf32>
    %10 = vector.shape_cast %9 : vector<16x512xf32> to vector<8x2x512xf32>
    %c0_7 = arith.constant 0 : index
    %c0_8 = arith.constant 0 : index
    %c0_9 = arith.constant 0 : index
    %11 = vector.load %arg11[%c0_7, %c0_8, %c0_9] : memref<8x2x512xf32, #tpu.memory_space<vmem>>, vector<8x2x512xf32>
    tpu.vector_store %arg11[%c0_7, %c0_8, %c0_9], %10 {strides = array<i32>} : memref<8x2x512xf32, #tpu.memory_space<vmem>>, vector<8x2x512xf32>,
    %c0_10 = arith.constant 0 : index
    %c0_11 = arith.constant 0 : index
    %12 = vector.load %arg4[%c0_10, %c0_11] : memref<128x512xf32, #tpu.memory_space<vmem>>, vector<128x512xf32>
    %c0_12 = arith.constant 0 : index
    %c0_13 = arith.constant 0 : index
    %13 = vector.load %arg9[%c0_12, %c0_13] : memref<2x128xf32, #tpu.memory_space<vmem>>, vector<2x128xf32>
    %c0_14 = arith.constant 0 : index
    %c0_15 = arith.constant 0 : index
    %14 = vector.load %arg10[%c0_14, %c0_15] : memref<2x128xf32, #tpu.memory_space<vmem>>, vector<2x128xf32>
    %c0_i32_16 = arith.constant 0 : i32
    %15 = arith.index_cast %c0_i32_16 : i32 to index
    %c0_17 = arith.constant 0 : index
    %c0_18 = arith.constant 0 : index
    %16 = vector.load %arg11[%15, %c0_17, %c0_18] : memref<8x2x512xf32, #tpu.memory_space<vmem>>, vector<1x2x512xf32>
    %17 = vector.shape_cast %16 : vector<1x2x512xf32> to vector<2x512xf32>
    %cst_19 = arith.constant dense<0.000000e+00> : vector<2x512xf32>
    %18 = tpu.matmul %13, %12, %cst_19 {dimension_numbers = #tpu.dot_dimension_numbers<[1], [0], [0], [1], [0, 0, 1, 1], [], []>} : vector<2x128xf32>, vector<128x512xf32>, vector<2x512xf32> -> vector<2x512xf32>
    %19 = arith.addf %17, %18 : vector<2x512xf32>
    %20 = vector.extract_strided_slice %19 {offsets = [0, 0], sizes = [2, 128], strides = [1, 1]} : vector<2x512xf32> to vector<2x128xf32>
    %21 = arith.negf %20 : vector<2x128xf32>
    %22 = math.exp %21 : vector<2x128xf32>
    %cst_20 = arith.constant 1.000000e+00 : f32
    %23 = vector.broadcast %cst_20 : f32 to vector<2x128xf32>
    %24 = arith.addf %23, %22 : vector<2x128xf32>
    %25 = arith.divf %23, %24 : vector<2x128xf32>
    %26 = vector.extract_strided_slice %19 {offsets = [0, 128], sizes = [2, 128], strides = [1, 1]} : vector<2x512xf32> to vector<2x128xf32>
    %27 = arith.negf %26 : vector<2x128xf32>
    %28 = math.exp %27 : vector<2x128xf32>
    %cst_21 = arith.constant 1.000000e+00 : f32
    %29 = vector.broadcast %cst_21 : f32 to vector<2x128xf32>
    %30 = arith.addf %29, %28 : vector<2x128xf32>
    %31 = arith.divf %29, %30 : vector<2x128xf32>
    %32 = vector.extract_strided_slice %19 {offsets = [0, 256], sizes = [2, 128], strides = [1, 1]} : vector<2x512xf32> to vector<2x128xf32>
    %33 = math.tanh %32 : vector<2x128xf32>
    %34 = vector.extract_strided_slice %19 {offsets = [0, 384], sizes = [2, 128], strides = [1, 1]} : vector<2x512xf32> to vector<2x128xf32>
    %35 = arith.negf %34 : vector<2x128xf32>
    %36 = math.exp %35 : vector<2x128xf32>
    %cst_22 = arith.constant 1.000000e+00 : f32
    %37 = vector.broadcast %cst_22 : f32 to vector<2x128xf32>
    %38 = arith.addf %37, %36 : vector<2x128xf32>
    %39 = arith.divf %37, %38 : vector<2x128xf32>
    %40 = arith.mulf %31, %14 : vector<2x128xf32>
    %41 = arith.mulf %25, %33 : vector<2x128xf32>
    %42 = arith.addf %40, %41 : vector<2x128xf32>
    %43 = math.tanh %42 : vector<2x128xf32>
    %44 = arith.mulf %39, %43 : vector<2x128xf32>
    %45 = arith.index_cast %c0_i32_16 : i32 to index
    %c0_23 = arith.constant 0 : index
    %c0_24 = arith.constant 0 : index
    %46 = vector.load %arg12[%45, %c0_23, %c0_24] : memref<8x2x128xf32, #tpu.memory_space<vmem>>, vector<1x2x128xf32>
    %47 = vector.shape_cast %46 : vector<1x2x128xf32> to vector<2x128xf32>
    %48 = vector.shape_cast %44 : vector<2x128xf32> to vector<1x2x128xf32>
    tpu.vector_store %arg12[%45, %c0_23, %c0_24], %48 {strides = array<i32>} : memref<8x2x128xf32, #tpu.memory_space<vmem>>, vector<1x2x128xf32>,
    %c1_i32 = arith.constant 1 : i32
    %49 = arith.index_cast %c1_i32 : i32 to index
    %c0_25 = arith.constant 0 : index
    %c0_26 = arith.constant 0 : index
    %50 = vector.load %arg11[%49, %c0_25, %c0_26] : memref<8x2x512xf32, #tpu.memory_space<vmem>>, vector<1x2x512xf32>
    %51 = vector.shape_cast %50 : vector<1x2x512xf32> to vector<2x512xf32>
    %cst_27 = arith.constant dense<0.000000e+00> : vector<2x512xf32>
    %52 = tpu.matmul %44, %12, %cst_27 {dimension_numbers = #tpu.dot_dimension_numbers<[1], [0], [0], [1], [0, 0, 1, 1], [], []>} : vector<2x128xf32>, vector<128x512xf32>, vector<2x512xf32> -> vector<2x512xf32>
    %53 = arith.addf %51, %52 : vector<2x512xf32>
    %54 = vector.extract_strided_slice %53 {offsets = [0, 0], sizes = [2, 128], strides = [1, 1]} : vector<2x512xf32> to vector<2x128xf32>
    %55 = arith.negf %54 : vector<2x128xf32>
    %56 = math.exp %55 : vector<2x128xf32>
    %cst_28 = arith.constant 1.000000e+00 : f32
    %57 = vector.broadcast %cst_28 : f32 to vector<2x128xf32>
    %58 = arith.addf %57, %56 : vector<2x128xf32>
    %59 = arith.divf %57, %58 : vector<2x128xf32>
    %60 = vector.extract_strided_slice %53 {offsets = [0, 128], sizes = [2, 128], strides = [1, 1]} : vector<2x512xf32> to vector<2x128xf32>
    %61 = arith.negf %60 : vector<2x128xf32>
    %62 = math.exp %61 : vector<2x128xf32>
    %cst_29 = arith.constant 1.000000e+00 : f32
    %63 = vector.broadcast %cst_29 : f32 to vector<2x128xf32>
    %64 = arith.addf %63, %62 : vector<2x128xf32>
    %65 = arith.divf %63, %64 : vector<2x128xf32>
    %66 = vector.extract_strided_slice %53 {offsets = [0, 256], sizes = [2, 128], strides = [1, 1]} : vector<2x512xf32> to vector<2x128xf32>
    %67 = math.tanh %66 : vector<2x128xf32>
    %68 = vector.extract_strided_slice %53 {offsets = [0, 384], sizes = [2, 128], strides = [1, 1]} : vector<2x512xf32> to vector<2x128xf32>
    %69 = arith.negf %68 : vector<2x128xf32>
    %70 = math.exp %69 : vector<2x128xf32>
    %cst_30 = arith.constant 1.000000e+00 : f32
    %71 = vector.broadcast %cst_30 : f32 to vector<2x128xf32>
    %72 = arith.addf %71, %70 : vector<2x128xf32>
    %73 = arith.divf %71, %72 : vector<2x128xf32>
    %74 = arith.mulf %65, %42 : vector<2x128xf32>
    %75 = arith.mulf %59, %67 : vector<2x128xf32>
    %76 = arith.addf %74, %75 : vector<2x128xf32>
    %77 = math.tanh %76 : vector<2x128xf32>
    %78 = arith.mulf %73, %77 : vector<2x128xf32>
    %79 = arith.index_cast %c1_i32 : i32 to index
    %c0_31 = arith.constant 0 : index
    %c0_32 = arith.constant 0 : index
    %80 = vector.load %arg12[%79, %c0_31, %c0_32] : memref<8x2x128xf32, #tpu.memory_space<vmem>>, vector<1x2x128xf32>
    %81 = vector.shape_cast %80 : vector<1x2x128xf32> to vector<2x128xf32>
    %82 = vector.shape_cast %78 : vector<2x128xf32> to vector<1x2x128xf32>
    tpu.vector_store %arg12[%79, %c0_31, %c0_32], %82 {strides = array<i32>} : memref<8x2x128xf32, #tpu.memory_space<vmem>>, vector<1x2x128xf32>,
    %c2_i32 = arith.constant 2 : i32
    %83 = arith.index_cast %c2_i32 : i32 to index
    %c0_33 = arith.constant 0 : index
    %c0_34 = arith.constant 0 : index
    %84 = vector.load %arg11[%83, %c0_33, %c0_34] : memref<8x2x512xf32, #tpu.memory_space<vmem>>, vector<1x2x512xf32>
    %85 = vector.shape_cast %84 : vector<1x2x512xf32> to vector<2x512xf32>
    %cst_35 = arith.constant dense<0.000000e+00> : vector<2x512xf32>
    %86 = tpu.matmul %78, %12, %cst_35 {dimension_numbers = #tpu.dot_dimension_numbers<[1], [0], [0], [1], [0, 0, 1, 1], [], []>} : vector<2x128xf32>, vector<128x512xf32>, vector<2x512xf32> -> vector<2x512xf32>
    %87 = arith.addf %85, %86 : vector<2x512xf32>
    %88 = vector.extract_strided_slice %87 {offsets = [0, 0], sizes = [2, 128], strides = [1, 1]} : vector<2x512xf32> to vector<2x128xf32>
    %89 = arith.negf %88 : vector<2x128xf32>
    %90 = math.exp %89 : vector<2x128xf32>
    %cst_36 = arith.constant 1.000000e+00 : f32
    %91 = vector.broadcast %cst_36 : f32 to vector<2x128xf32>
    %92 = arith.addf %91, %90 : vector<2x128xf32>
    %93 = arith.divf %91, %92 : vector<2x128xf32>
    %94 = vector.extract_strided_slice %87 {offsets = [0, 128], sizes = [2, 128], strides = [1, 1]} : vector<2x512xf32> to vector<2x128xf32>
    %95 = arith.negf %94 : vector<2x128xf32>
    %96 = math.exp %95 : vector<2x128xf32>
    %cst_37 = arith.constant 1.000000e+00 : f32
    %97 = vector.broadcast %cst_37 : f32 to vector<2x128xf32>
    %98 = arith.addf %97, %96 : vector<2x128xf32>
    %99 = arith.divf %97, %98 : vector<2x128xf32>
    %100 = vector.extract_strided_slice %87 {offsets = [0, 256], sizes = [2, 128], strides = [1, 1]} : vector<2x512xf32> to vector<2x128xf32>
    %101 = math.tanh %100 : vector<2x128xf32>
    %102 = vector.extract_strided_slice %87 {offsets = [0, 384], sizes = [2, 128], strides = [1, 1]} : vector<2x512xf32> to vector<2x128xf32>
    %103 = arith.negf %102 : vector<2x128xf32>
    %104 = math.exp %103 : vector<2x128xf32>
    %cst_38 = arith.constant 1.000000e+00 : f32
    %105 = vector.broadcast %cst_38 : f32 to vector<2x128xf32>
    %106 = arith.addf %105, %104 : vector<2x128xf32>
    %107 = arith.divf %105, %106 : vector<2x128xf32>
    %108 = arith.mulf %99, %76 : vector<2x128xf32>
    %109 = arith.mulf %93, %101 : vector<2x128xf32>
    %110 = arith.addf %108, %109 : vector<2x128xf32>
    %111 = math.tanh %110 : vector<2x128xf32>
    %112 = arith.mulf %107, %111 : vector<2x128xf32>
    %113 = arith.index_cast %c2_i32 : i32 to index
    %c0_39 = arith.constant 0 : index
    %c0_40 = arith.constant 0 : index
    %114 = vector.load %arg12[%113, %c0_39, %c0_40] : memref<8x2x128xf32, #tpu.memory_space<vmem>>, vector<1x2x128xf32>
    %115 = vector.shape_cast %114 : vector<1x2x128xf32> to vector<2x128xf32>
    %116 = vector.shape_cast %112 : vector<2x128xf32> to vector<1x2x128xf32>
    tpu.vector_store %arg12[%113, %c0_39, %c0_40], %116 {strides = array<i32>} : memref<8x2x128xf32, #tpu.memory_space<vmem>>, vector<1x2x128xf32>,
    %c3_i32 = arith.constant 3 : i32
    %117 = arith.index_cast %c3_i32 : i32 to index
    %c0_41 = arith.constant 0 : index
    %c0_42 = arith.constant 0 : index
    %118 = vector.load %arg11[%117, %c0_41, %c0_42] : memref<8x2x512xf32, #tpu.memory_space<vmem>>, vector<1x2x512xf32>
    %119 = vector.shape_cast %118 : vector<1x2x512xf32> to vector<2x512xf32>
    %cst_43 = arith.constant dense<0.000000e+00> : vector<2x512xf32>
    %120 = tpu.matmul %112, %12, %cst_43 {dimension_numbers = #tpu.dot_dimension_numbers<[1], [0], [0], [1], [0, 0, 1, 1], [], []>} : vector<2x128xf32>, vector<128x512xf32>, vector<2x512xf32> -> vector<2x512xf32>
    %121 = arith.addf %119, %120 : vector<2x512xf32>
    %122 = vector.extract_strided_slice %121 {offsets = [0, 0], sizes = [2, 128], strides = [1, 1]} : vector<2x512xf32> to vector<2x128xf32>
    %123 = arith.negf %122 : vector<2x128xf32>
    %124 = math.exp %123 : vector<2x128xf32>
    %cst_44 = arith.constant 1.000000e+00 : f32
    %125 = vector.broadcast %cst_44 : f32 to vector<2x128xf32>
    %126 = arith.addf %125, %124 : vector<2x128xf32>
    %127 = arith.divf %125, %126 : vector<2x128xf32>
    %128 = vector.extract_strided_slice %121 {offsets = [0, 128], sizes = [2, 128], strides = [1, 1]} : vector<2x512xf32> to vector<2x128xf32>
    %129 = arith.negf %128 : vector<2x128xf32>
    %130 = math.exp %129 : vector<2x128xf32>
    %cst_45 = arith.constant 1.000000e+00 : f32
    %131 = vector.broadcast %cst_45 : f32 to vector<2x128xf32>
    %132 = arith.addf %131, %130 : vector<2x128xf32>
    %133 = arith.divf %131, %132 : vector<2x128xf32>
    %134 = vector.extract_strided_slice %121 {offsets = [0, 256], sizes = [2, 128], strides = [1, 1]} : vector<2x512xf32> to vector<2x128xf32>
    %135 = math.tanh %134 : vector<2x128xf32>
    %136 = vector.extract_strided_slice %121 {offsets = [0, 384], sizes = [2, 128], strides = [1, 1]} : vector<2x512xf32> to vector<2x128xf32>
    %137 = arith.negf %136 : vector<2x128xf32>
    %138 = math.exp %137 : vector<2x128xf32>
    %cst_46 = arith.constant 1.000000e+00 : f32
    %139 = vector.broadcast %cst_46 : f32 to vector<2x128xf32>
    %140 = arith.addf %139, %138 : vector<2x128xf32>
    %141 = arith.divf %139, %140 : vector<2x128xf32>
    %142 = arith.mulf %133, %110 : vector<2x128xf32>
    %143 = arith.mulf %127, %135 : vector<2x128xf32>
    %144 = arith.addf %142, %143 : vector<2x128xf32>
    %145 = math.tanh %144 : vector<2x128xf32>
    %146 = arith.mulf %141, %145 : vector<2x128xf32>
    %147 = arith.index_cast %c3_i32 : i32 to index
    %c0_47 = arith.constant 0 : index
    %c0_48 = arith.constant 0 : index
    %148 = vector.load %arg12[%147, %c0_47, %c0_48] : memref<8x2x128xf32, #tpu.memory_space<vmem>>, vector<1x2x128xf32>
    %149 = vector.shape_cast %148 : vector<1x2x128xf32> to vector<2x128xf32>
    %150 = vector.shape_cast %146 : vector<2x128xf32> to vector<1x2x128xf32>
    tpu.vector_store %arg12[%147, %c0_47, %c0_48], %150 {strides = array<i32>} : memref<8x2x128xf32, #tpu.memory_space<vmem>>, vector<1x2x128xf32>,
    %c4_i32 = arith.constant 4 : i32
    %151 = arith.index_cast %c4_i32 : i32 to index
    %c0_49 = arith.constant 0 : index
    %c0_50 = arith.constant 0 : index
    %152 = vector.load %arg11[%151, %c0_49, %c0_50] : memref<8x2x512xf32, #tpu.memory_space<vmem>>, vector<1x2x512xf32>
    %153 = vector.shape_cast %152 : vector<1x2x512xf32> to vector<2x512xf32>
    %cst_51 = arith.constant dense<0.000000e+00> : vector<2x512xf32>
    %154 = tpu.matmul %146, %12, %cst_51 {dimension_numbers = #tpu.dot_dimension_numbers<[1], [0], [0], [1], [0, 0, 1, 1], [], []>} : vector<2x128xf32>, vector<128x512xf32>, vector<2x512xf32> -> vector<2x512xf32>
    %155 = arith.addf %153, %154 : vector<2x512xf32>
    %156 = vector.extract_strided_slice %155 {offsets = [0, 0], sizes = [2, 128], strides = [1, 1]} : vector<2x512xf32> to vector<2x128xf32>
    %157 = arith.negf %156 : vector<2x128xf32>
    %158 = math.exp %157 : vector<2x128xf32>
    %cst_52 = arith.constant 1.000000e+00 : f32
    %159 = vector.broadcast %cst_52 : f32 to vector<2x128xf32>
    %160 = arith.addf %159, %158 : vector<2x128xf32>
    %161 = arith.divf %159, %160 : vector<2x128xf32>
    %162 = vector.extract_strided_slice %155 {offsets = [0, 128], sizes = [2, 128], strides = [1, 1]} : vector<2x512xf32> to vector<2x128xf32>
    %163 = arith.negf %162 : vector<2x128xf32>
    %164 = math.exp %163 : vector<2x128xf32>
    %cst_53 = arith.constant 1.000000e+00 : f32
    %165 = vector.broadcast %cst_53 : f32 to vector<2x128xf32>
    %166 = arith.addf %165, %164 : vector<2x128xf32>
    %167 = arith.divf %165, %166 : vector<2x128xf32>
    %168 = vector.extract_strided_slice %155 {offsets = [0, 256], sizes = [2, 128], strides = [1, 1]} : vector<2x512xf32> to vector<2x128xf32>
    %169 = math.tanh %168 : vector<2x128xf32>
    %170 = vector.extract_strided_slice %155 {offsets = [0, 384], sizes = [2, 128], strides = [1, 1]} : vector<2x512xf32> to vector<2x128xf32>
    %171 = arith.negf %170 : vector<2x128xf32>
    %172 = math.exp %171 : vector<2x128xf32>
    %cst_54 = arith.constant 1.000000e+00 : f32
    %173 = vector.broadcast %cst_54 : f32 to vector<2x128xf32>
    %174 = arith.addf %173, %172 : vector<2x128xf32>
    %175 = arith.divf %173, %174 : vector<2x128xf32>
    %176 = arith.mulf %167, %144 : vector<2x128xf32>
    %177 = arith.mulf %161, %169 : vector<2x128xf32>
    %178 = arith.addf %176, %177 : vector<2x128xf32>
    %179 = math.tanh %178 : vector<2x128xf32>
    %180 = arith.mulf %175, %179 : vector<2x128xf32>
    %181 = arith.index_cast %c4_i32 : i32 to index
    %c0_55 = arith.constant 0 : index
    %c0_56 = arith.constant 0 : index
    %182 = vector.load %arg12[%181, %c0_55, %c0_56] : memref<8x2x128xf32, #tpu.memory_space<vmem>>, vector<1x2x128xf32>
    %183 = vector.shape_cast %182 : vector<1x2x128xf32> to vector<2x128xf32>
    %184 = vector.shape_cast %180 : vector<2x128xf32> to vector<1x2x128xf32>
    tpu.vector_store %arg12[%181, %c0_55, %c0_56], %184 {strides = array<i32>} : memref<8x2x128xf32, #tpu.memory_space<vmem>>, vector<1x2x128xf32>,
    %c5_i32 = arith.constant 5 : i32
    %185 = arith.index_cast %c5_i32 : i32 to index
    %c0_57 = arith.constant 0 : index
    %c0_58 = arith.constant 0 : index
    %186 = vector.load %arg11[%185, %c0_57, %c0_58] : memref<8x2x512xf32, #tpu.memory_space<vmem>>, vector<1x2x512xf32>
    %187 = vector.shape_cast %186 : vector<1x2x512xf32> to vector<2x512xf32>
    %cst_59 = arith.constant dense<0.000000e+00> : vector<2x512xf32>
    %188 = tpu.matmul %180, %12, %cst_59 {dimension_numbers = #tpu.dot_dimension_numbers<[1], [0], [0], [1], [0, 0, 1, 1], [], []>} : vector<2x128xf32>, vector<128x512xf32>, vector<2x512xf32> -> vector<2x512xf32>
    %189 = arith.addf %187, %188 : vector<2x512xf32>
    %190 = vector.extract_strided_slice %189 {offsets = [0, 0], sizes = [2, 128], strides = [1, 1]} : vector<2x512xf32> to vector<2x128xf32>
    %191 = arith.negf %190 : vector<2x128xf32>
    %192 = math.exp %191 : vector<2x128xf32>
    %cst_60 = arith.constant 1.000000e+00 : f32
    %193 = vector.broadcast %cst_60 : f32 to vector<2x128xf32>
    %194 = arith.addf %193, %192 : vector<2x128xf32>
    %195 = arith.divf %193, %194 : vector<2x128xf32>
    %196 = vector.extract_strided_slice %189 {offsets = [0, 128], sizes = [2, 128], strides = [1, 1]} : vector<2x512xf32> to vector<2x128xf32>
    %197 = arith.negf %196 : vector<2x128xf32>
    %198 = math.exp %197 : vector<2x128xf32>
    %cst_61 = arith.constant 1.000000e+00 : f32
    %199 = vector.broadcast %cst_61 : f32 to vector<2x128xf32>
    %200 = arith.addf %199, %198 : vector<2x128xf32>
    %201 = arith.divf %199, %200 : vector<2x128xf32>
    %202 = vector.extract_strided_slice %189 {offsets = [0, 256], sizes = [2, 128], strides = [1, 1]} : vector<2x512xf32> to vector<2x128xf32>
    %203 = math.tanh %202 : vector<2x128xf32>
    %204 = vector.extract_strided_slice %189 {offsets = [0, 384], sizes = [2, 128], strides = [1, 1]} : vector<2x512xf32> to vector<2x128xf32>
    %205 = arith.negf %204 : vector<2x128xf32>
    %206 = math.exp %205 : vector<2x128xf32>
    %cst_62 = arith.constant 1.000000e+00 : f32
    %207 = vector.broadcast %cst_62 : f32 to vector<2x128xf32>
    %208 = arith.addf %207, %206 : vector<2x128xf32>
    %209 = arith.divf %207, %208 : vector<2x128xf32>
    %210 = arith.mulf %201, %178 : vector<2x128xf32>
    %211 = arith.mulf %195, %203 : vector<2x128xf32>
    %212 = arith.addf %210, %211 : vector<2x128xf32>
    %213 = math.tanh %212 : vector<2x128xf32>
    %214 = arith.mulf %209, %213 : vector<2x128xf32>
    %215 = arith.index_cast %c5_i32 : i32 to index
    %c0_63 = arith.constant 0 : index
    %c0_64 = arith.constant 0 : index
    %216 = vector.load %arg12[%215, %c0_63, %c0_64] : memref<8x2x128xf32, #tpu.memory_space<vmem>>, vector<1x2x128xf32>
    %217 = vector.shape_cast %216 : vector<1x2x128xf32> to vector<2x128xf32>
    %218 = vector.shape_cast %214 : vector<2x128xf32> to vector<1x2x128xf32>
    tpu.vector_store %arg12[%215, %c0_63, %c0_64], %218 {strides = array<i32>} : memref<8x2x128xf32, #tpu.memory_space<vmem>>, vector<1x2x128xf32>,
    %c6_i32 = arith.constant 6 : i32
    %219 = arith.index_cast %c6_i32 : i32 to index
    %c0_65 = arith.constant 0 : index
    %c0_66 = arith.constant 0 : index
    %220 = vector.load %arg11[%219, %c0_65, %c0_66] : memref<8x2x512xf32, #tpu.memory_space<vmem>>, vector<1x2x512xf32>
    %221 = vector.shape_cast %220 : vector<1x2x512xf32> to vector<2x512xf32>
    %cst_67 = arith.constant dense<0.000000e+00> : vector<2x512xf32>
    %222 = tpu.matmul %214, %12, %cst_67 {dimension_numbers = #tpu.dot_dimension_numbers<[1], [0], [0], [1], [0, 0, 1, 1], [], []>} : vector<2x128xf32>, vector<128x512xf32>, vector<2x512xf32> -> vector<2x512xf32>
    %223 = arith.addf %221, %222 : vector<2x512xf32>
    %224 = vector.extract_strided_slice %223 {offsets = [0, 0], sizes = [2, 128], strides = [1, 1]} : vector<2x512xf32> to vector<2x128xf32>
    %225 = arith.negf %224 : vector<2x128xf32>
    %226 = math.exp %225 : vector<2x128xf32>
    %cst_68 = arith.constant 1.000000e+00 : f32
    %227 = vector.broadcast %cst_68 : f32 to vector<2x128xf32>
    %228 = arith.addf %227, %226 : vector<2x128xf32>
    %229 = arith.divf %227, %228 : vector<2x128xf32>
    %230 = vector.extract_strided_slice %223 {offsets = [0, 128], sizes = [2, 128], strides = [1, 1]} : vector<2x512xf32> to vector<2x128xf32>
    %231 = arith.negf %230 : vector<2x128xf32>
    %232 = math.exp %231 : vector<2x128xf32>
    %cst_69 = arith.constant 1.000000e+00 : f32
    %233 = vector.broadcast %cst_69 : f32 to vector<2x128xf32>
    %234 = arith.addf %233, %232 : vector<2x128xf32>
    %235 = arith.divf %233, %234 : vector<2x128xf32>
    %236 = vector.extract_strided_slice %223 {offsets = [0, 256], sizes = [2, 128], strides = [1, 1]} : vector<2x512xf32> to vector<2x128xf32>
    %237 = math.tanh %236 : vector<2x128xf32>
    %238 = vector.extract_strided_slice %223 {offsets = [0, 384], sizes = [2, 128], strides = [1, 1]} : vector<2x512xf32> to vector<2x128xf32>
    %239 = arith.negf %238 : vector<2x128xf32>
    %240 = math.exp %239 : vector<2x128xf32>
    %cst_70 = arith.constant 1.000000e+00 : f32
    %241 = vector.broadcast %cst_70 : f32 to vector<2x128xf32>
    %242 = arith.addf %241, %240 : vector<2x128xf32>
    %243 = arith.divf %241, %242 : vector<2x128xf32>
    %244 = arith.mulf %235, %212 : vector<2x128xf32>
    %245 = arith.mulf %229, %237 : vector<2x128xf32>
    %246 = arith.addf %244, %245 : vector<2x128xf32>
    %247 = math.tanh %246 : vector<2x128xf32>
    %248 = arith.mulf %243, %247 : vector<2x128xf32>
    %249 = arith.index_cast %c6_i32 : i32 to index
    %c0_71 = arith.constant 0 : index
    %c0_72 = arith.constant 0 : index
    %250 = vector.load %arg12[%249, %c0_71, %c0_72] : memref<8x2x128xf32, #tpu.memory_space<vmem>>, vector<1x2x128xf32>
    %251 = vector.shape_cast %250 : vector<1x2x128xf32> to vector<2x128xf32>
    %252 = vector.shape_cast %248 : vector<2x128xf32> to vector<1x2x128xf32>
    tpu.vector_store %arg12[%249, %c0_71, %c0_72], %252 {strides = array<i32>} : memref<8x2x128xf32, #tpu.memory_space<vmem>>, vector<1x2x128xf32>,
    %c7_i32 = arith.constant 7 : i32
    %253 = arith.index_cast %c7_i32 : i32 to index
    %c0_73 = arith.constant 0 : index
    %c0_74 = arith.constant 0 : index
    %254 = vector.load %arg11[%253, %c0_73, %c0_74] : memref<8x2x512xf32, #tpu.memory_space<vmem>>, vector<1x2x512xf32>
    %255 = vector.shape_cast %254 : vector<1x2x512xf32> to vector<2x512xf32>
    %cst_75 = arith.constant dense<0.000000e+00> : vector<2x512xf32>
    %256 = tpu.matmul %248, %12, %cst_75 {dimension_numbers = #tpu.dot_dimension_numbers<[1], [0], [0], [1], [0, 0, 1, 1], [], []>} : vector<2x128xf32>, vector<128x512xf32>, vector<2x512xf32> -> vector<2x512xf32>
    %257 = arith.addf %255, %256 : vector<2x512xf32>
    %258 = vector.extract_strided_slice %257 {offsets = [0, 0], sizes = [2, 128], strides = [1, 1]} : vector<2x512xf32> to vector<2x128xf32>
    %259 = arith.negf %258 : vector<2x128xf32>
    %260 = math.exp %259 : vector<2x128xf32>
    %cst_76 = arith.constant 1.000000e+00 : f32
    %261 = vector.broadcast %cst_76 : f32 to vector<2x128xf32>
    %262 = arith.addf %261, %260 : vector<2x128xf32>
    %263 = arith.divf %261, %262 : vector<2x128xf32>
    %264 = vector.extract_strided_slice %257 {offsets = [0, 128], sizes = [2, 128], strides = [1, 1]} : vector<2x512xf32> to vector<2x128xf32>
    %265 = arith.negf %264 : vector<2x128xf32>
    %266 = math.exp %265 : vector<2x128xf32>
    %cst_77 = arith.constant 1.000000e+00 : f32
    %267 = vector.broadcast %cst_77 : f32 to vector<2x128xf32>
    %268 = arith.addf %267, %266 : vector<2x128xf32>
    %269 = arith.divf %267, %268 : vector<2x128xf32>
    %270 = vector.extract_strided_slice %257 {offsets = [0, 256], sizes = [2, 128], strides = [1, 1]} : vector<2x512xf32> to vector<2x128xf32>
    %271 = math.tanh %270 : vector<2x128xf32>
    %272 = vector.extract_strided_slice %257 {offsets = [0, 384], sizes = [2, 128], strides = [1, 1]} : vector<2x512xf32> to vector<2x128xf32>
    %273 = arith.negf %272 : vector<2x128xf32>
    %274 = math.exp %273 : vector<2x128xf32>
    %cst_78 = arith.constant 1.000000e+00 : f32
    %275 = vector.broadcast %cst_78 : f32 to vector<2x128xf32>
    %276 = arith.addf %275, %274 : vector<2x128xf32>
    %277 = arith.divf %275, %276 : vector<2x128xf32>
    %278 = arith.mulf %269, %246 : vector<2x128xf32>
    %279 = arith.mulf %263, %271 : vector<2x128xf32>
    %280 = arith.addf %278, %279 : vector<2x128xf32>
    %281 = math.tanh %280 : vector<2x128xf32>
    %282 = arith.mulf %277, %281 : vector<2x128xf32>
    %283 = arith.index_cast %c7_i32 : i32 to index
    %c0_79 = arith.constant 0 : index
    %c0_80 = arith.constant 0 : index
    %284 = vector.load %arg12[%283, %c0_79, %c0_80] : memref<8x2x128xf32, #tpu.memory_space<vmem>>, vector<1x2x128xf32>
    %285 = vector.shape_cast %284 : vector<1x2x128xf32> to vector<2x128xf32>
    %286 = vector.shape_cast %282 : vector<2x128xf32> to vector<1x2x128xf32>
    tpu.vector_store %arg12[%283, %c0_79, %c0_80], %286 {strides = array<i32>} : memref<8x2x128xf32, #tpu.memory_space<vmem>>, vector<1x2x128xf32>,
    %c8_i32 = arith.constant 8 : i32
    %c0_81 = arith.constant 0 : index
    %c0_82 = arith.constant 0 : index
    %287 = vector.load %arg9[%c0_81, %c0_82] : memref<2x128xf32, #tpu.memory_space<vmem>>, vector<2x128xf32>
    tpu.vector_store %arg9[%c0_81, %c0_82], %282 {strides = array<i32>} : memref<2x128xf32, #tpu.memory_space<vmem>>, vector<2x128xf32>,
    %c0_83 = arith.constant 0 : index
    %c0_84 = arith.constant 0 : index
    %288 = vector.load %arg10[%c0_83, %c0_84] : memref<2x128xf32, #tpu.memory_space<vmem>>, vector<2x128xf32>
    tpu.vector_store %arg10[%c0_83, %c0_84], %280 {strides = array<i32>} : memref<2x128xf32, #tpu.memory_space<vmem>>, vector<2x128xf32>,
    %c0_85 = arith.constant 0 : index
    %c0_86 = arith.constant 0 : index
    %c0_87 = arith.constant 0 : index
    %289 = vector.load %arg12[%c0_85, %c0_86, %c0_87] : memref<8x2x128xf32, #tpu.memory_space<vmem>>, vector<8x2x128xf32>
    %290 = vector.shape_cast %289 : vector<8x2x128xf32> to vector<16x128xf32>
    %c0_88 = arith.constant 0 : index
    %c0_89 = arith.constant 0 : index
    %291 = vector.load %arg6[%c0_88, %c0_89] : memref<128x128xf32, #tpu.memory_space<vmem>>, vector<128x128xf32>
    %cst_90 = arith.constant dense<0.000000e+00> : vector<16x128xf32>
    %292 = tpu.matmul %290, %291, %cst_90 {dimension_numbers = #tpu.dot_dimension_numbers<[1], [0], [0], [1], [0, 0, 1, 1], [], []>} : vector<16x128xf32>, vector<128x128xf32>, vector<16x128xf32> -> vector<16x128xf32>
    %c0_91 = arith.constant 0 : index
    %c0_92 = arith.constant 0 : index
    %293 = vector.load %arg7[%c0_91, %c0_92] : memref<1x128xf32, #tpu.memory_space<vmem>>, vector<1x128xf32>
    %294 = vector.broadcast %293 : vector<1x128xf32> to vector<16x128xf32>
    %295 = arith.addf %292, %294 : vector<16x128xf32>
    %296 = vector.shape_cast %295 : vector<16x128xf32> to vector<8x2x128xf32>
    %c0_93 = arith.constant 0 : index
    %c0_94 = arith.constant 0 : index
    %c0_95 = arith.constant 0 : index
    %297 = vector.load %arg8[%c0_93, %c0_94, %c0_95] : memref<8x2x128xf32, #tpu.memory_space<vmem>>, vector<8x2x128xf32>
    tpu.vector_store %arg8[%c0_93, %c0_94, %c0_95], %296 {strides = array<i32>} : memref<8x2x128xf32, #tpu.memory_space<vmem>>, vector<8x2x128xf32>,
    return
  }
  func.func @transform_0(%arg0: i32, %arg1: i32) -> (i32, i32, i32) {
    %c0_i32 = arith.constant 0 : i32
    %c0_i32_0 = arith.constant 0 : i32
    return %arg1, %arg0, %c0_i32 : i32, i32, i32
  }
  func.func @transform_1(%arg0: i32, %arg1: i32) -> (i32, i32) {
    %c0_i32 = arith.constant 0 : i32
    %c0_i32_0 = arith.constant 0 : i32
    %c0_i32_1 = arith.constant 0 : i32
    return %c0_i32, %c0_i32_0 : i32, i32
  }
  func.func @transform_2(%arg0: i32, %arg1: i32) -> (i32, i32) {
    %c0_i32 = arith.constant 0 : i32
    %c0_i32_0 = arith.constant 0 : i32
    %c0_i32_1 = arith.constant 0 : i32
    return %c0_i32, %c0_i32_0 : i32, i32
  }
  func.func @transform_3(%arg0: i32, %arg1: i32) -> (i32, i32) {
    %c0_i32 = arith.constant 0 : i32
    %c0_i32_0 = arith.constant 0 : i32
    %c0_i32_1 = arith.constant 0 : i32
    return %c0_i32, %c0_i32_0 : i32, i32
  }
  func.func @transform_4(%arg0: i32, %arg1: i32) -> (i32, i32) {
    %c0_i32 = arith.constant 0 : i32
    %c0_i32_0 = arith.constant 0 : i32
    %c0_i32_1 = arith.constant 0 : i32
    return %c0_i32, %c0_i32_0 : i32, i32
  }
  func.func @transform_5(%arg0: i32, %arg1: i32) -> (i32, i32) {
    %c0_i32 = arith.constant 0 : i32
    %c0_i32_0 = arith.constant 0 : i32
    %c0_i32_1 = arith.constant 0 : i32
    return %c0_i32, %c0_i32_0 : i32, i32
  }
  func.func @transform_6(%arg0: i32, %arg1: i32) -> (i32, i32, i32) {
    %c0_i32 = arith.constant 0 : i32
    %c0_i32_0 = arith.constant 0 : i32
    return %arg1, %arg0, %c0_i32 : i32, i32, i32
  }
}

</mosaic_0001>

<bundles_post_ra>
// kernel: tpu_custom_call.1
= control target key start
LH: loop header
LB: loop body
LE: loop exit
PB: predicated region body
PF: predicated region fallthrough
CT: control target
= control target key end

     0   :  { %11 = vsyncpa [#allocation7], 0  ;;  %s3726_s0 = inlined_call_operand.hbm [shape: f32[8,2,15], index: 0, kind: input, shape index: {}]   ;;  %s3727_s1 = inlined_call_operand.hbm [shape: f32[15,512], index: 1, kind: input, shape index: {}]   ;;  %s3728_s2 = inlined_call_operand.hbm [shape: f32[128,512], index: 2, kind: input, shape index: {}]   ;;  %s3729_s3 = inlined_call_operand.vmem [shape: f32[1,512], index: 3, kind: input, shape index: {}]   ;;  %s3730_s4 = inlined_call_operand.hbm [shape: f32[128,128], index: 4, kind: input, shape index: {}]   ;;  %s3731_s5 = inlined_call_operand.vmem [shape: f32[1,128], index: 5, kind: input, shape index: {}]   ;;  %s3732_s6 = inlined_call_operand.hbm [shape: f32[8,2,128], index: 6, kind: output, shape index: {}]  }
   0x1   :  { %12 = vsyncpa [#allocation10], 0 }
   0x2   :  { %13 = vsyncpa [#allocation13], 0 }
   0x3   :  { %14 = vsyncpa [#allocation8], 0  ;;  %s2722_s21 = smov [#allocation9]  }
   0x4   :  { %s32_s22 = sshll.u32 %s2722_s21, 4  ;;  %s33_s22 = int_to_ptr.vmem [resolvable:$true] %s32_s22 }
   0x5   :  { %s2622_s23 = scalar_lea.vmem %s33_s22, 1024  ;;  %p2627_p1 = scmp.lt.s32.totalorder %s33_s22, %s33_s22 }
   0x6   :  { %p2623_p0 = scmp.ne.s32.totalorder %s33_s22, %s2622_s23  ;;  %p2628_p2 = scmp.lt.s32.totalorder %s2622_s23, %s2622_s23 }
   0x8   :  { %p2629_p3 = por %p2628_p2, %p2627_p1 }
   0xa   :  { %p2630_p4 = pnand %p2629_p3, %p2623_p0 }
   0xc   :  { %2633 = shalt.err (!%p2630_p4)
}
   0xd   :  { %s2723_s24 = smov 512   ;;  %s2724_s25 = smov 32  }
   0xe   :  { %38 = dma.hbm_to_vmem [thread:$0]  %s3727_s1, 1024, %s33_s22, [#allocation10], %s2723_s24, %s2723_s24, %s2724_s25  }
   0xf   :  { %s2725_s28 = smov [#allocation6]  }
  0x10   :  { %s20_s29 = sshll.u32 %s2725_s28, 4  ;;  %s21_s29 = int_to_ptr.vmem [resolvable:$true] %s20_s29 }
  0x11   :  { %s2642_s30 = scalar_lea.vmem %s21_s29, 256  ;;  %p2647_p6 = scmp.lt.s32.totalorder %s21_s29, %s21_s29 }
  0x12   :  { %p2643_p5 = scmp.ne.s32.totalorder %s21_s29, %s2642_s30  ;;  %p2648_p7 = scmp.lt.s32.totalorder %s2642_s30, %s2642_s30 }
  0x14   :  { %p2649_p8 = por %p2648_p7, %p2647_p6 }
  0x16   :  { %p2650_p9 = pnand %p2649_p8, %p2643_p5 }
  0x18   :  { %2653 = shalt.err (!%p2650_p9)
}
  0x19   :  { %s2726_s7 = smov 2   ;;  %s2727_s10 = smov [#allocation11]  }
  0x1a   :  { %26 = dma.hbm_to_vmem [thread:$0]  %s3726_s0, 256, %s21_s29, [#allocation7], %s2724_s25, %s2724_s25, %s2726_s7  }
  0x1b   :  { %s44_s1 = sshll.u32 %s2727_s10, 4  ;;  %s2728_s11 = smov [#allocation12]   ;;  %s45_s1 = int_to_ptr.vmem [resolvable:$true] %s44_s1 }
  0x1c   :  { %s58_s12 = sshll.u32 %s2728_s11, 4  ;;  %s2662_s13 = scalar_lea.vmem %s45_s1, 8192  ;;  %s59_s12 = int_to_ptr.vmem [resolvable:$true] %s58_s12 }
  0x1d   :  { %p2663_p10 = scmp.ne.s32.totalorder %s45_s1, %s2662_s13  ;;  %p2667_p11 = scmp.lt.s32.totalorder %s45_s1, %s45_s1 }
  0x1e   :  { %p2668_p12 = scmp.lt.s32.totalorder %s2662_s13, %s2662_s13 }
  0x20   :  { %p2669_p13 = por %p2668_p12, %p2667_p11 }
  0x22   :  { %p2670_p0 = pnand %p2669_p13, %p2663_p10 }
  0x24   :  { %2673 = shalt.err (!%p2670_p0)
}
  0x25   :  { %50 = dma.hbm_to_vmem [thread:$0]  %s3728_s2, 8192, %s45_s1, [#allocation10], %s2723_s24, %s2723_s24, %s2724_s25  }
  0x26   :  { %s2682_s0 = scalar_lea.vmem %s59_s12, 2048  ;;  %p2687_p2 = scmp.lt.s32.totalorder %s59_s12, %s59_s12 }
  0x27   :  { %p2683_p1 = scmp.ne.s32.totalorder %s59_s12, %s2682_s0  ;;  %p2688_p3 = scmp.lt.s32.totalorder %s2682_s0, %s2682_s0 }
  0x29   :  { %p2689_p4 = por %p2688_p3, %p2687_p2 }
  0x2b   :  { %p2690_p5 = pnand %p2689_p4, %p2683_p1 }
  0x2d   :  { %2693 = shalt.err (!%p2690_p5)
}
  0x2e   :  { %s2729_s16 = smov 128   ;;  %s2730_s17 = smov 8  }
  0x2f   :  { %64 = dma.hbm_to_vmem [thread:$0]  %s3730_s4, 2048, %s59_s12, [#allocation13], %s2729_s16, %s2729_s16, %s2730_s17  }
  0x30   :  { %2714 = dma.done.wait [#allocation7], 256  }
  0x31   :  { %2715 = vsyncadd [#allocation7], 4294967040 }
  0x32   :  { %2716 = dma.done.wait [#allocation10], 9216  }
  0x33   :  { %2717 = vsyncadd [#allocation10], 4294958080 }
  0x34   :  { %2718 = dma.done.wait [#allocation13], 2048  }
  0x35   :  { %2719 = vsyncadd [#allocation13], 4294965248  ;;  %v103_v0 = vlaneseq  ;;  %v3733_v1 = vmov 0.0   ;;  %v2732_v2 = vmov 1983009808   ;;  %vm170_vm0 = vcmask 1046528  }
  0x36   :  { %247 = vmatprep.mubr.f32.mxu1 %v3733_v1  ;;  %83 = vst [vmem:[#allocation2] sm:$0x3] %v3733_v1  ;;  %84 = vst [vmem:[#allocation3] sm:$0x3] %v3733_v1  ;;  %v134_v3 = vunpack.c.l.s4 %v2732_v2  ;;  %564 = vmatprep.mubr.f32.mxu0 %v3733_v1  ;;  %v98_v6 = vld [vmem:[#allocation9 + $0x28] sm:$0x7f] }
  0x37   :  { %v2794_v4 = vshrl.u32 %v103_v0, 7  ;;  %v97_v7 = vld [vmem:[#allocation9 + $0x20] sm:$0x7f]  ;;  %v94_v8 = vld [vmem:[#allocation9 + $0x8] sm:$0xff]  ;;  %2320 = vmatprep.subr.msk.mxu1 %vm170_vm0, %v98_v6  ;;  %v100_v10 = vld [vmem:[#allocation9 + $0x38] sm:$0x7f] }
  0x38   :  { %v135_v5 = vunpack.c.0.s8 %v134_v3  ;;  %v93_v9 = vld [vmem:[#allocation9] sm:$0xff]  ;;  %v85_v11 = vld [vmem:[#allocation6] sm:$0x3]  ;;  %2321 = vmatpush1.msk.msra.mxu1 %vm170_vm0, %v97_v7  ;;  %v86_v13 = vld [vmem:[#allocation6 + $0x2] sm:$0x3]  ;;  %vm165_vm1 = vcmask 121856  }
  0x39   :  { %3854 = vst [vmem:[#allocation19_spill] sm:$0xff] %v2794_v4  ;;  %v87_v14 = vld [vmem:[#allocation6 + $0x4] sm:$0x3]  ;;  %v88_v15 = vld [vmem:[#allocation6 + $0x6] sm:$0x3]  ;;  %213 = vmatprep.subr.mxu1 %v94_v8  ;;  %v131_v16 = vcombine.low %v85_v11, %v86_v13  ;;  %v2804_v26 = vld [vmem:[#allocation11 + $0x1e8] sm:$0xff] }
  0x3a   :  { %v2798_v12 = vsub.s32 %v135_v5, %v2794_v4  ;;  %v132_v17 = vcombine.low %v87_v14, %v88_v15  ;;  %v89_v18 = vld [vmem:[#allocation6 + $0x8] sm:$0x3]  ;;  %214 = vmatpush1.msra.mxu1 %v93_v9  ;;  %v90_v19 = vld [vmem:[#allocation6 + $0xa] sm:$0x3]  ;;  %v91_v20 = vld [vmem:[#allocation6 + $0xc] sm:$0x3]  ;;  %500 = vmatprep.subr.mxu0 %v2804_v26 }
  0x3b   :  { %v92_v21 = vld [vmem:[#allocation6 + $0xe] sm:$0x3]  ;;  %2324 = vmatprep.subr.msk.mxu1 %vm170_vm0, %v100_v10  ;;  %v148_v24 = vcombine.low %v89_v18, %v90_v19  ;;  %3856 = vst [vmem:[#allocation21_spill] sm:$0xff] %v2804_v26  ;;  %v2806_v27 = vld [vmem:[#allocation11 + $0x1e0] sm:$0xff]  ;;  %v2809_v28 = vld [vmem:[#allocation11 + $0x1c8] sm:$0xff]  ;;  %v3882_v4 = vmov 0.0  }
  0x3c   :  { %3855 = vst [vmem:[#allocation20_spill] sm:$0xff] %v2798_v12  ;;  %v139_v22 = vrot.slane %v131_v16, %v2798_v12  ;;  %v146_v23 = vrot.slane %v132_v17, %v2798_v12  ;;  %v149_v25 = vcombine.low %v91_v20, %v92_v21  ;;  %v2811_v29 = vld [vmem:[#allocation11 + $0x1c0] sm:$0xff]  ;;  %v99_v31 = vld [vmem:[#allocation9 + $0x30] sm:$0x7f]  ;;  %501 = vmatpush1.msra.mxu0 %v2806_v27  ;;  %v96_v34 = vld [vmem:[#allocation9 + $0x18] sm:$0xff]  ;;  %s2733_s21 = smov [#allocation14]  }
  0x3d   :  { %v156_v32 = vrot.slane %v148_v24, %v2798_v12  ;;  %502 = vmatprep.subr.mxu0 %v2809_v28  ;;  %v2817_v35 = vld [vmem:[#allocation11 + $0x1a8] sm:$0xff]  ;;  %v95_v37 = vld [vmem:[#allocation9 + $0x10] sm:$0xff]  ;;  %v2821_v38 = vld [vmem:[#allocation11 + $0x1a0] sm:$0xff]  ;;  %s2306_s22 = sshll.u32 %s2733_s21, 4  ;;  %s2307_s22 = int_to_ptr.vmem [resolvable:$true] %s2306_s22 }
  0x3e   :  { %v147_v30 = vcombine.low %v139_v22, %v146_v23  ;;  %v163_v33 = vrot.slane %v149_v25, %v2798_v12  ;;  %503 = vmatpush1.msra.mxu0 %v2811_v29  ;;  %v2825_v39 = vld [vmem:[#allocation11 + $0x1f8] sm:$0xff]  ;;  %v2828_v40 = vld [vmem:[#allocation11 + $0x188] sm:$0xff]  ;;  %v2831_v41 = vld [vmem:[#allocation11 + $0x180] sm:$0xff]  ;;  %p2699_p7 = scmp.lt.s32.totalorder %s2307_s22, %s2307_s22 }
  0x3f   :  { %3857 = vst [vmem:[#allocation22_spill] sm:$0xff] %v2825_v39  ;;  %504 = vmatprep.subr.mxu0 %v2817_v35  ;;  %v2835_v42 = vld [vmem:[#allocation11 + $0x168] sm:$0xff]  ;;  %v2839_v43 = vld [vmem:[#allocation11 + $0x160] sm:$0xff]  ;;  %v2841_v44 = vld [vmem:[#allocation11 + $0x1f0] sm:$0xff] }
  0x40   :  { %2322 = vmatmul.mubr.msk.f32.vlgmr.msra.gmra.mxu1 %vm165_vm1, %v147_v30  ;;  %v164_v36 = vcombine.low %v156_v32, %v163_v33  ;;  %505 = vmatpush1.msra.mxu0 %v2821_v38  ;;  %v2844_v45 = vld [vmem:[#allocation11 + $0x1d8] sm:$0xff]  ;;  %v2847_v46 = vld [vmem:[#allocation11 + $0x148] sm:$0xff]  ;;  %v2850_v47 = vld [vmem:[#allocation11 + $0x1d0] sm:$0xff] }
  0x41   :  { %2325 = vmatpush1.msk.msra.mxu1 %vm170_vm0, %v99_v31  ;;  %253 = vmatprep.mubr.f32.mxu1 %v3733_v1  ;;  %v2853_v48 = vld [vmem:[#allocation11 + $0x140] sm:$0xff]  ;;  %v2857_v49 = vld [vmem:[#allocation11 + $0x1b8] sm:$0xff]  ;;  %v2860_v50 = vld [vmem:[#allocation11 + $0x1b0] sm:$0xff] }
  0x42   :  { %290 = vmatprep.subr.mxu1 %v96_v34  ;;  %506 = vmatprep.subr.mxu0 %v2828_v40  ;;  %v2863_v51 = vld [vmem:[#allocation11 + $0x128] sm:$0xff]  ;;  %v2866_v52 = vld [vmem:[#allocation11 + $0x198] sm:$0xff]  ;;  %v2869_v53 = vld [vmem:[#allocation11 + $0x120] sm:$0xff] }
  0x43   :  { %291 = vmatpush1.msra.mxu1 %v95_v37  ;;  %507 = vmatpush1.msra.mxu0 %v2831_v41  ;;  %v2873_v54 = vld [vmem:[#allocation11 + $0x190] sm:$0xff]  ;;  %v2875_v55 = vld [vmem:[#allocation11 + $0x108] sm:$0xff]  ;;  %v2878_v56 = vld [vmem:[#allocation11 + $0x178] sm:$0xff] }
  0x44   :  { %2323 = vmatmul.mubr.msk.f32.gmra.mxu1 %vm165_vm1, %v164_v36  ;;  %571 = vmatprep.subr.mxu1 %v2825_v39  ;;  %v2881_v57 = vld [vmem:[#allocation11 + $0x100] sm:$0xff]  ;;  %v2884_v58 = vld [vmem:[#allocation11 + $0x170] sm:$0xff]  ;;  %v2887_v59 = vld [vmem:[#allocation11 + $0xe8] sm:$0xff] }
  0x45   :  { %324 = vmatprep.mubr.f32.mxu1 %v3733_v1  ;;  %508 = vmatprep.subr.mxu0 %v2835_v42  ;;  %v2890_v60 = vld [vmem:[#allocation11 + $0x158] sm:$0xff]  ;;  %v2893_v61 = vld [vmem:[#allocation11 + $0xe0] sm:$0xff]  ;;  %v2896_v62 = vld [vmem:[#allocation11 + $0x150] sm:$0xff] }
  0x46   :  { %509 = vmatpush1.msra.mxu0 %v2839_v43  ;;  %v2899_v63 = vld [vmem:[#allocation11 + $0xc8] sm:$0xff]  ;;  %v2902_v0 = vld [vmem:[#allocation11 + $0x138] sm:$0xff]  ;;  %v2905_v2 = vld [vmem:[#allocation11 + $0xc0] sm:$0xff] }
  0x47   :  { %510 = vmatprep.subr.mxu0 %v2847_v46  ;;  %3858 = vst [vmem:[#allocation23_spill] sm:$0xff] %v2905_v2  ;;  %v2908_v3 = vld [vmem:[#allocation11 + $0x130] sm:$0xff]  ;;  %v2911_v5 = vld [vmem:[#allocation11 + $0xa8] sm:$0xff]  ;;  %v2914_v6 = vld [vmem:[#allocation11 + $0x118] sm:$0xff] }
  0x48   :  { %2326 = vmatmul.mubr.msk.f32.vlgmr.msra.gmra.mxu1 %vm165_vm1, %v147_v30  ;;  %511 = vmatpush1.msra.mxu0 %v2853_v48  ;;  %3859 = vst [vmem:[#allocation24_spill] sm:$0xff] %v2911_v5  ;;  %v2917_v7 = vld [vmem:[#allocation11 + $0xa0] sm:$0xff]  ;;  %v2920_v8 = vld [vmem:[#allocation11 + $0x110] sm:$0xff]  ;;  %v2923_v9 = vld [vmem:[#allocation11 + $0x88] sm:$0xff] }
  0x49   :  { %572 = vmatpush1.msra.mxu1 %v2841_v44  ;;  %330 = vmatprep.mubr.f32.mxu1 %v3733_v1  ;;  %3860 = vst [vmem:[#allocation25_spill] sm:$0xff] %v2917_v7  ;;  %3861 = vst [vmem:[#allocation26_spill] sm:$0xff] %v2923_v9  ;;  %v2926_v10 = vld [vmem:[#allocation11 + $0xf8] sm:$0xff]  ;;  %v2929_v11 = vld [vmem:[#allocation11 + $0x80] sm:$0xff] }
  0x4a   :  { %573 = vmatprep.subr.mxu1 %v2844_v45  ;;  %512 = vmatprep.subr.mxu0 %v2863_v51  ;;  %3862 = vst [vmem:[#allocation27_spill] sm:$0xff] %v2929_v11  ;;  %v2932_v13 = vld [vmem:[#allocation11 + $0xf0] sm:$0xff]  ;;  %v2935_v14 = vld [vmem:[#allocation11 + $0x68] sm:$0xff]  ;;  %v2938_v15 = vld [vmem:[#allocation11 + $0xd8] sm:$0xff] }
  0x4b   :  { %574 = vmatpush1.msra.mxu1 %v2850_v47  ;;  %513 = vmatpush1.msra.mxu0 %v2869_v53  ;;  %3863 = vst [vmem:[#allocation28_spill] sm:$0xff] %v2935_v14  ;;  %v2941_v16 = vld [vmem:[#allocation11 + $0x60] sm:$0xff]  ;;  %v2944_v17 = vld [vmem:[#allocation11 + $0xd0] sm:$0xff]  ;;  %v2947_v18 = vld [vmem:[#allocation11 + $0x48] sm:$0xff] }
  0x4c   :  { %575 = vmatprep.subr.mxu1 %v2857_v49  ;;  %2327 = vmatmul.mubr.msk.f32.gmra.mxu1 %vm165_vm1, %v164_v36  ;;  %3864 = vst [vmem:[#allocation29_spill] sm:$0xff] %v2941_v16  ;;  %3865 = vst [vmem:[#allocation30_spill] sm:$0xff] %v2944_v17  ;;  %v2950_v19 = vld [vmem:[#allocation11 + $0xb8] sm:$0xff]  ;;  %v2953_v20 = vld [vmem:[#allocation11 + $0x40] sm:$0xff] }
  0x4d   :  { %576 = vmatpush1.msra.mxu1 %v2860_v50  ;;  %514 = vmatprep.subr.mxu0 %v2875_v55  ;;  %3866 = vst [vmem:[#allocation31_spill] sm:$0xff] %v2947_v18  ;;  %3867 = vst [vmem:[#allocation32_spill] sm:$0xff] %v2950_v19  ;;  %v2956_v21 = vld [vmem:[#allocation11 + $0xb0] sm:$0xff]  ;;  %v2959_v22 = vld [vmem:[#allocation11 + $0x28] sm:$0xff] }
  0x4e   :  { %577 = vmatprep.subr.mxu1 %v2866_v52  ;;  %515 = vmatpush1.msra.mxu0 %v2881_v57  ;;  %3868 = vst [vmem:[#allocation33_spill] sm:$0xff] %v2953_v20  ;;  %3869 = vst [vmem:[#allocation34_spill] sm:$0xff] %v2956_v21  ;;  %v2962_v23 = vld [vmem:[#allocation11 + $0x98] sm:$0xff]  ;;  %v2965_v24 = vld [vmem:[#allocation11 + $0x20] sm:$0xff] }
  0x4f   :  { %578 = vmatpush1.msra.mxu1 %v2873_v54  ;;  %516 = vmatprep.subr.mxu0 %v2887_v59  ;;  %3870 = vst [vmem:[#allocation35_spill] sm:$0xff] %v2959_v22  ;;  %3871 = vst [vmem:[#allocation36_spill] sm:$0xff] %v2962_v23  ;;  %v2968_v25 = vld [vmem:[#allocation11 + $0x90] sm:$0xff]  ;;  %v2971_v30 = vld [vmem:[#allocation11 + $0x8] sm:$0xff] }
  0x50   :  { %579 = vmatprep.subr.mxu1 %v2878_v56  ;;  %517 = vmatpush1.msra.mxu0 %v2893_v61  ;;  %3872 = vst [vmem:[#allocation37_spill] sm:$0xff] %v2965_v24  ;;  %3873 = vst [vmem:[#allocation38_spill] sm:$0xff] %v2968_v25  ;;  %v2974_v31 = vld [vmem:[#allocation11 + $0x78] sm:$0xff]  ;;  %v2977_v32 = vld [vmem:[#allocation11] sm:$0xff] }
  0x51   :  { %580 = vmatpush1.msra.mxu1 %v2884_v58  ;;  %518 = vmatprep.subr.mxu0 %v2899_v63  ;;  %3874 = vst [vmem:[#allocation39_spill] sm:$0xff] %v2971_v30  ;;  %3875 = vst [vmem:[#allocation40_spill] sm:$0xff] %v2974_v31  ;;  %v2980_v33 = vld [vmem:[#allocation11 + $0x70] sm:$0xff]  ;;  %v497_v34 = vld [vmem:[#allocation2] sm:$0x3] }
  0x52   :  { %581 = vmatprep.subr.mxu1 %v2890_v60  ;;  %519 = vmatpush1.msra.mxu0 %v2905_v2  ;;  %3876 = vst [vmem:[#allocation41_spill] sm:$0xff] %v2977_v32  ;;  %3877 = vst [vmem:[#allocation42_spill] sm:$0xff] %v2980_v33  ;;  %v2984_v36 = vld [vmem:[#allocation11 + $0x58] sm:$0xff]  ;;  %v2988_v37 = vld [vmem:[#allocation11 + $0x50] sm:$0xff] }
  0x53   :  { %582 = vmatpush1.msra.mxu1 %v2896_v62  ;;  %520 = vmatprep.subr.mxu0 %v2911_v5  ;;  %3878 = vst [vmem:[#allocation43_spill] sm:$0xff] %v2984_v36  ;;  %3879 = vst [vmem:[#allocation44_spill] sm:$0xff] %v2988_v37  ;;  %v2992_v1 = vld [vmem:[#allocation11 + $0x38] sm:$0xff]  ;;  %v2995_v12 = vld [vmem:[#allocation11 + $0x30] sm:$0xff] }
  0x54   :  { %583 = vmatprep.subr.mxu1 %v2902_v0  ;;  %521 = vmatpush1.msra.mxu0 %v2917_v7  ;;  %3880 = vst [vmem:[#allocation45_spill] sm:$0xff] %v2992_v1  ;;  %3881 = vst [vmem:[#allocation46_spill] sm:$0xff] %v2995_v12 }
  0x55   :  { %584 = vmatpush1.msra.mxu1 %v2908_v3  ;;  %522 = vmatprep.subr.mxu0 %v2923_v9 }
  0x56   :  { %585 = vmatprep.subr.mxu1 %v2914_v6  ;;  %523 = vmatpush1.msra.mxu0 %v2929_v11 }
  0x57   :  { %586 = vmatpush1.msra.mxu1 %v2920_v8  ;;  %524 = vmatprep.subr.mxu0 %v2935_v14 }
  0x58   :  { %587 = vmatprep.subr.mxu1 %v2926_v10  ;;  %525 = vmatpush1.msra.mxu0 %v2941_v16 }
  0x59   :  { %588 = vmatpush1.msra.mxu1 %v2932_v13  ;;  %526 = vmatprep.subr.mxu0 %v2947_v18 }
  0x5a   :  { %589 = vmatprep.subr.mxu1 %v2938_v15  ;;  %527 = vmatpush1.msra.mxu0 %v2953_v20 }
  0x5b   :  { %590 = vmatpush1.msra.mxu1 %v2944_v17  ;;  %528 = vmatprep.subr.mxu0 %v2959_v22 }
  0x5c   :  { %591 = vmatprep.subr.mxu1 %v2950_v19  ;;  %529 = vmatpush1.msra.mxu0 %v2965_v24 }
  0x5d   :  { %592 = vmatpush1.msra.mxu1 %v2956_v21  ;;  %530 = vmatprep.subr.mxu0 %v2971_v30  ;;  %v2999_v30 = vld [vmem:[#allocation11 + $0x18] sm:$0xff] }
  0x5e   :  { %593 = vmatprep.subr.mxu1 %v2962_v23  ;;  %531 = vmatpush1.msra.mxu0 %v2977_v32  ;;  %3883 = vst [vmem:[#allocation47_spill] sm:$0xff] %v2999_v30  ;;  %v3003_v32 = vld [vmem:[#allocation11 + $0x10] sm:$0xff] }
  0x5f   :  { %594 = vmatpush1.msra.mxu1 %v2968_v25  ;;  %565 = vmatmul.mubr.f32.vlgmr.msra.gmra.mxu0 %v497_v34  ;;  %3884 = vst [vmem:[#allocation48_spill] sm:$0xff] %v3003_v32 }
  0x60   :  { %595 = vmatprep.subr.mxu1 %v2974_v31  ;;  %635 = vmatprep.mubr.f32.mxu1 %v3882_v4 }
  0x61   :  { %596 = vmatpush1.msra.mxu1 %v2980_v33  ;;  %699 = vmatprep.subr.mxu0 %v2804_v26 }
  0x62   :  { %597 = vmatprep.subr.mxu1 %v2984_v36  ;;  %700 = vmatpush1.msra.mxu0 %v2806_v27 }
  0x63   :  { %598 = vmatpush1.msra.mxu1 %v2988_v37  ;;  %701 = vmatprep.subr.mxu0 %v2809_v28 }
  0x64   :  { %599 = vmatprep.subr.mxu1 %v2992_v1  ;;  %702 = vmatpush1.msra.mxu0 %v2811_v29 }
  0x65   :  { %600 = vmatpush1.msra.mxu1 %v2995_v12  ;;  %703 = vmatprep.subr.mxu0 %v2817_v35 }
  0x66   :  { %601 = vmatprep.subr.mxu1 %v2999_v30  ;;  %704 = vmatpush1.msra.mxu0 %v2821_v38 }
  0x67   :  { %602 = vmatpush1.msra.mxu1 %v3003_v32  ;;  %705 = vmatprep.subr.mxu0 %v2828_v40 }
  0x68   :  { %636 = vmatmul.mubr.f32.vlgmr.msra.gmra.mxu1 %v497_v34  ;;  %770 = vmatprep.subr.mxu1 %v2825_v39  ;;  %v3885_v34 = vld [vmem:[#allocation39_spill] sm:$0xff] }
  0x69   :  { %771 = vmatpush1.msra.mxu1 %v2841_v44  ;;  %706 = vmatpush1.msra.mxu0 %v2831_v41 }
  0x6a   :  { %772 = vmatprep.subr.mxu1 %v2844_v45  ;;  %707 = vmatprep.subr.mxu0 %v2835_v42 }
  0x6b   :  { %773 = vmatpush1.msra.mxu1 %v2850_v47  ;;  %708 = vmatpush1.msra.mxu0 %v2839_v43 }
  0x6c   :  { %774 = vmatprep.subr.mxu1 %v2857_v49  ;;  %709 = vmatprep.subr.mxu0 %v2847_v46 }
  0x6d   :  { %775 = vmatpush1.msra.mxu1 %v2860_v50  ;;  %710 = vmatpush1.msra.mxu0 %v2853_v48 }
  0x6e   :  { %776 = vmatprep.subr.mxu1 %v2866_v52  ;;  %711 = vmatprep.subr.mxu0 %v2863_v51 }
  0x6f   :  { %777 = vmatpush1.msra.mxu1 %v2873_v54  ;;  %712 = vmatpush1.msra.mxu0 %v2869_v53 }
  0x70   :  { %778 = vmatprep.subr.mxu1 %v2878_v56  ;;  %713 = vmatprep.subr.mxu0 %v2875_v55 }
  0x71   :  { %779 = vmatpush1.msra.mxu1 %v2884_v58  ;;  %714 = vmatpush1.msra.mxu0 %v2881_v57 }
  0x72   :  { %780 = vmatprep.subr.mxu1 %v2890_v60  ;;  %715 = vmatprep.subr.mxu0 %v2887_v59 }
  0x73   :  { %781 = vmatpush1.msra.mxu1 %v2896_v62  ;;  %716 = vmatpush1.msra.mxu0 %v2893_v61 }
  0x74   :  { %782 = vmatprep.subr.mxu1 %v2902_v0  ;;  %717 = vmatprep.subr.mxu0 %v2899_v63 }
  0x75   :  { %783 = vmatpush1.msra.mxu1 %v2908_v3  ;;  %718 = vmatpush1.msra.mxu0 %v2905_v2 }
  0x76   :  { %784 = vmatprep.subr.mxu1 %v2914_v6  ;;  %719 = vmatprep.subr.mxu0 %v2911_v5 }
  0x77   :  { %785 = vmatpush1.msra.mxu1 %v2920_v8  ;;  %720 = vmatpush1.msra.mxu0 %v2917_v7 }
  0x78   :  { %786 = vmatprep.subr.mxu1 %v2926_v10  ;;  %721 = vmatprep.subr.mxu0 %v2923_v9 }
  0x79   :  { %787 = vmatpush1.msra.mxu1 %v2932_v13  ;;  %722 = vmatpush1.msra.mxu0 %v2929_v11 }
  0x7a   :  { %788 = vmatprep.subr.mxu1 %v2938_v15  ;;  %723 = vmatprep.subr.mxu0 %v2935_v14 }
  0x7b   :  { %789 = vmatpush1.msra.mxu1 %v2944_v17  ;;  %724 = vmatpush1.msra.mxu0 %v2941_v16  ;;  %v3886_v16 = vld [vmem:[#allocation41_spill] sm:$0xff]  ;;  %v3888_v17 = vld [vmem:[#allocation20_spill] sm:$0xff] }
  0x7c   :  { %790 = vmatprep.subr.mxu1 %v2950_v19  ;;  %725 = vmatprep.subr.mxu0 %v2947_v18 }
  0x7d   :  { %791 = vmatpush1.msra.mxu1 %v2956_v21  ;;  %726 = vmatpush1.msra.mxu0 %v2953_v20 }
  0x7e   :  { %792 = vmatprep.subr.mxu1 %v2962_v23  ;;  %727 = vmatprep.subr.mxu0 %v2959_v22 }
  0x7f   :  { %793 = vmatpush1.msra.mxu1 %v2968_v25  ;;  %728 = vmatpush1.msra.mxu0 %v2965_v24 }
  0x80   :  { %794 = vmatprep.subr.mxu1 %v2974_v31  ;;  %729 = vmatprep.subr.mxu0 %v3885_v34  ;;  %v3887_v34 = vld [vmem:[#allocation19_spill] sm:$0xff] }
  0x81   :  { %795 = vmatpush1.msra.mxu1 %v2980_v33  ;;  %730 = vmatpush1.msra.mxu0 %v3886_v16  ;;  %v105_v24 = vsub.s32 0, %v3887_v34  ;;  %v109_v16 = vsub.s32 1, %v3887_v34 }
  0x82   :  { %796 = vmatprep.subr.mxu1 %v2984_v36  ;;  %763 = vmatprep.mubr.f32.mxu0 %v3882_v4 }
  0x83   :  { %797 = vmatpush1.msra.mxu1 %v2988_v37  ;;  %834 = vmatprep.mubr.f32.mxu1 %v3882_v4 }
  0x84   :  { %798 = vmatprep.subr.mxu1 %v2992_v1  ;;  %899 = vmatprep.subr.mxu0 %v2804_v26  ;;  %v101_v1 = vld [vmem:[%s3729_s3] sm:$0xf]  ;;  %v113_v26 = vsub.s32 2, %v3887_v34 }
  0x85   :  { %799 = vmatpush1.msra.mxu1 %v2995_v12  ;;  %v106_v22 = vrot.slane %v101_v1, %v105_v24  ;;  %v110_v12 = vrot.slane %v101_v1, %v109_v16 }
  0x86   :  { %800 = vmatprep.subr.mxu1 %v2999_v30  ;;  %v114_v14 = vrot.slane %v101_v1, %v113_v26 }
  0x87   :  { %801 = vmatpush1.msra.mxu1 %v3003_v32  ;;  %v117_v32 = vsub.s32 3, %v3887_v34 }
  0x88   :  { %970 = vmatprep.subr.mxu1 %v2825_v39 }
  0x89   :  { %v118_v25 = vrot.slane %v101_v1, %v117_v32 }
 0x100   :  { %v249_v37 = vpop.f32.mrf.mxu1 }
 0x101   :  { %v250_v20 = vadd.f32 %v249_v37, %v106_v22 }
 0x102   :  { %v251_v4 = vpop.f32.mrf.mxu1 }
 0x103   :  { %v252_v30 = vadd.f32 %v251_v4, %v110_v12 }
 0x104   :  { %v255_v36 = vpop.f32.mrf.mxu1 }
 0x105   :  { %v346_v39 = vcombine.high %v250_v20, %v252_v30  ;;  %v256_v18 = vadd.f32 %v255_v36, %v106_v22  ;;  %v345_v24 = vcombine.low %v250_v20, %v252_v30 }
 0x106   :  { %v257_v33 = vpop.f32.mrf.mxu1 }
 0x107   :  { %v258_v31 = vadd.f32 %v257_v33, %v110_v12  ;;  %v3083_v34 = vrot.slane %v345_v24, %v3888_v17  ;;  %v3086_v22 = vrot.slane %v346_v39, %v3888_v17 }
 0x108   :  { %v326_v11 = vpop.f32.mrf.mxu1 }
 0x109   :  { %v381_v23 = vcombine.low %v256_v18, %v258_v31  ;;  %v382_v9 = vcombine.high %v256_v18, %v258_v31  ;;  %v327_v21 = vadd.f32 %v326_v11, %v114_v14  ;;  %3889 = vst [vmem:[#allocation19_spill] sm:$0xff] %v3086_v22  ;;  %v3912_v11 = vld [vmem:[#allocation44_spill] sm:$0xff]  ;;  %v3918_v22 = vld [vmem:[#allocation47_spill] sm:$0xff] }
 0x10a   :  { %v328_v16 = vpop.f32.mrf.mxu1 }
 0x10b   :  { %v329_v7 = vadd.f32 %v328_v16, %v118_v25  ;;  %v3101_v39 = vrot.slane %v381_v23, %v3888_v17 }
 0x10c   :  { %v332_v37 = vpop.f32.mrf.mxu1 }
 0x10d   :  { %v347_v4 = vcombine.low %v327_v21, %v329_v7  ;;  %v348_v19 = vcombine.high %v327_v21, %v329_v7  ;;  %v333_v5 = vadd.f32 %v332_v37, %v114_v14  ;;  %3891 = vst [vmem:[#allocation49_spill] sm:$0xff] %v3101_v39  ;;  %v3104_v21 = vrot.slane %v382_v9, %v3888_v17  ;;  %v3911_v7 = vld [vmem:[#allocation33_spill] sm:$0xff]  ;;  %v3916_v39 = vld [vmem:[#allocation46_spill] sm:$0xff] }
 0x10e   :  { %v334_v2 = vpop.f32.mrf.mxu1 }
 0x10f   :  { %v3089_v1 = vrot.slane %v347_v4, %v3888_v17  ;;  %v3092_v12 = vrot.slane %v348_v19, %v3888_v17  ;;  %v335_v26 = vadd.f32 %v334_v2, %v118_v25  ;;  %3892 = vst [vmem:[#allocation50_spill] sm:$0xff] %v3104_v21  ;;  %v3914_v21 = vld [vmem:[#allocation45_spill] sm:$0xff] }
 0x111   :  { %3890 = vst [vmem:[#allocation20_spill] sm:$0xff] %v3092_v12  ;;  %v383_v18 = vcombine.low %v333_v5, %v335_v26  ;;  %v384_v20 = vcombine.high %v333_v5, %v335_v26  ;;  %v377_v4 = vcombine.low %v3083_v34, %v3089_v1  ;;  %v3917_v12 = vld [vmem:[#allocation39_spill] sm:$0xff] }
 0x113   :  { %v3107_v19 = vrot.slane %v383_v18, %v3888_v17  ;;  %v3110_v2 = vrot.slane %v384_v20, %v3888_v17 }
 0x115   :  { %3893 = vst [vmem:[#allocation51_spill] sm:$0xff] %v3107_v19  ;;  %3894 = vst [vmem:[#allocation52_spill] sm:$0xff] %v3110_v2  ;;  %v3913_v2 = vld [vmem:[#allocation35_spill] sm:$0xff]  ;;  %v3915_v19 = vld [vmem:[#allocation37_spill] sm:$0xff] }
 0x11f   :  { %v566_v9 = vpop.f32.mrf.mxu0 }
 0x121   :  { %v568_v31 = vpop.f32.mrf.mxu0 }
 0x122   :  { %v646_v33 = vcombine.low %v566_v9, %v568_v31 }
 0x124   :  { %v654_v16 = vrot.slane %v646_v33, %v3888_v17 }
 0x128   :  { %v637_v32 = vpop.f32.mrf.mxu1 }
 0x12a   :  { %v639_v36 = vpop.f32.mrf.mxu1 }
 0x12b   :  { %v647_v24 = vcombine.low %v637_v32, %v639_v36 }
 0x12d   :  { %v661_v37 = vrot.slane %v647_v24, %v3888_v17 }
 0x12f   :  { %v662_v26 = vcombine.low %v654_v16, %v661_v37  ;;  %v498_v16 = vld [vmem:[#allocation3] sm:$0x3] }
 0x131   :  { %v664_v18 = vadd.f32 %v662_v26, %v377_v4 }
 0x133   :  { %v2328_v20 = vmul.f32 -1.442695, %v664_v18  ;;  %v672_v5 = vrot.slane %v664_v18, 2  ;;  %v683_v23 = vrot.slane %v664_v18, 6  ;;  %v680_v9 = vrot.slane %v664_v18, 4  ;;  %v3895_v18 = vld [vmem:[#allocation23_spill] sm:$0xff] }
 0x135   :  { %2422 = vpow2.f32 %v2328_v20  ;;  %v2329_v30 = vmul.f32 -1.442695, %v672_v5  ;;  %v2330_v25 = vmul.f32 -1.442695, %v683_v23 }
 0x137   :  { %2424 = vpow2.f32 %v2329_v30 }
 0x138   :  { %2426 = vpow2.f32 %v2330_v25 }
 0x142   :  { %v2423_v14 = vpop.eup %2422 }
 0x143   :  { %v668_v31 = vadd.f32 1.0, %v2423_v14 }
 0x144   :  { %v2425_v32 = vpop.eup %2424 }
 0x145   :  { %2428 = vrcp.f32 %v668_v31  ;;  %v677_v33 = vadd.f32 1.0, %v2425_v32  ;;  %v2427_v36 = vpop.eup %2426  ;;  %v3897_v31 = vld [vmem:[#allocation24_spill] sm:$0xff] }
 0x146   :  { %2430 = vtanh.f32 %v680_v9  ;;  %v688_v26 = vadd.f32 1.0, %v2427_v36  ;;  %v3896_v9 = vld [vmem:[#allocation30_spill] sm:$0xff]  ;;  %v3898_v32 = vld [vmem:[#allocation32_spill] sm:$0xff] }
 0x147   :  { %2432 = vrcp.f32 %v677_v33  ;;  %v3899_v33 = vld [vmem:[#allocation25_spill] sm:$0xff]  ;;  %v3900_v36 = vld [vmem:[#allocation34_spill] sm:$0xff] }
 0x148   :  { %2434 = vrcp.f32 %v688_v26  ;;  %v3905_v26 = vld [vmem:[#allocation28_spill] sm:$0xff] }
 0x152   :  { %v2429_v24 = vpop.eup %2428 }
 0x153   :  { %v2431_v37 = vpop.eup %2430 }
 0x154   :  { %v2433_v4 = vpop.eup %2432  ;;  %v692_v5 = vmul.f32 %v2431_v37, %v2429_v24  ;;  %v3901_v24 = vld [vmem:[#allocation26_spill] sm:$0xff]  ;;  %v3903_v37 = vld [vmem:[#allocation27_spill] sm:$0xff] }
 0x155   :  { %v691_v20 = vmul.f32 %v2433_v4, %v498_v16  ;;  %v2435_v14 = vpop.eup %2434  ;;  %v3902_v16 = vld [vmem:[#allocation36_spill] sm:$0xff]  ;;  %v3904_v4 = vld [vmem:[#allocation38_spill] sm:$0xff] }
 0x157   :  { %v3124_v30 = vadd.f32 %v692_v5, %v691_v20  ;;  %v3906_v20 = vld [vmem:[#allocation40_spill] sm:$0xff]  ;;  %v3907_v5 = vld [vmem:[#allocation29_spill] sm:$0xff] }
 0x159   :  { %2436 = vtanh.f32 %v3124_v30 }
 0x166   :  { %v2437_v23 = vpop.eup %2436 }
 0x167   :  { %v695_v25 = vmul.f32 %v2437_v23, %v2435_v14  ;;  %v3908_v14 = vld [vmem:[#allocation42_spill] sm:$0xff]  ;;  %v3909_v23 = vld [vmem:[#allocation31_spill] sm:$0xff] }
 0x169   :  { %696 = vst [vmem:[#allocation5] sm:$0x3] %v695_v25  ;;  %764 = vmatmul.mubr.f32.vlgmr.msra.gmra.mxu0 %v695_v25  ;;  %835 = vmatmul.mubr.f32.vlgmr.msra.gmra.mxu1 %v695_v25  ;;  %v3910_v25 = vld [vmem:[#allocation43_spill] sm:$0xff] }
 0x16a   :  { %900 = vmatpush1.msra.mxu0 %v2806_v27  ;;  %971 = vmatpush1.msra.mxu1 %v2841_v44 }
 0x16b   :  { %901 = vmatprep.subr.mxu0 %v2809_v28  ;;  %972 = vmatprep.subr.mxu1 %v2844_v45 }
 0x16c   :  { %902 = vmatpush1.msra.mxu0 %v2811_v29  ;;  %973 = vmatpush1.msra.mxu1 %v2850_v47 }
 0x16d   :  { %903 = vmatprep.subr.mxu0 %v2817_v35  ;;  %974 = vmatprep.subr.mxu1 %v2857_v49 }
 0x16e   :  { %904 = vmatpush1.msra.mxu0 %v2821_v38  ;;  %975 = vmatpush1.msra.mxu1 %v2860_v50 }
 0x16f   :  { %905 = vmatprep.subr.mxu0 %v2828_v40  ;;  %976 = vmatprep.subr.mxu1 %v2866_v52 }
 0x170   :  { %906 = vmatpush1.msra.mxu0 %v2831_v41  ;;  %977 = vmatpush1.msra.mxu1 %v2873_v54 }
 0x171   :  { %907 = vmatprep.subr.mxu0 %v2835_v42  ;;  %978 = vmatprep.subr.mxu1 %v2878_v56 }
 0x172   :  { %908 = vmatpush1.msra.mxu0 %v2839_v43  ;;  %979 = vmatpush1.msra.mxu1 %v2884_v58 }
 0x173   :  { %909 = vmatprep.subr.mxu0 %v2847_v46  ;;  %980 = vmatprep.subr.mxu1 %v2890_v60 }
 0x174   :  { %910 = vmatpush1.msra.mxu0 %v2853_v48  ;;  %981 = vmatpush1.msra.mxu1 %v2896_v62 }
 0x175   :  { %911 = vmatprep.subr.mxu0 %v2863_v51  ;;  %982 = vmatprep.subr.mxu1 %v2902_v0 }
 0x176   :  { %912 = vmatpush1.msra.mxu0 %v2869_v53  ;;  %983 = vmatpush1.msra.mxu1 %v2908_v3 }
 0x177   :  { %913 = vmatprep.subr.mxu0 %v2875_v55  ;;  %984 = vmatprep.subr.mxu1 %v2914_v6 }
 0x178   :  { %914 = vmatpush1.msra.mxu0 %v2881_v57  ;;  %985 = vmatpush1.msra.mxu1 %v2920_v8 }
 0x179   :  { %915 = vmatprep.subr.mxu0 %v2887_v59  ;;  %986 = vmatprep.subr.mxu1 %v2926_v10 }
 0x17a   :  { %916 = vmatpush1.msra.mxu0 %v2893_v61  ;;  %987 = vmatpush1.msra.mxu1 %v2932_v13 }
 0x17b   :  { %917 = vmatprep.subr.mxu0 %v2899_v63  ;;  %988 = vmatprep.subr.mxu1 %v2938_v15 }
 0x17c   :  { %918 = vmatpush1.msra.mxu0 %v3895_v18  ;;  %989 = vmatpush1.msra.mxu1 %v3896_v9 }
 0x17d   :  { %919 = vmatprep.subr.mxu0 %v3897_v31  ;;  %990 = vmatprep.subr.mxu1 %v3898_v32 }
 0x17e   :  { %920 = vmatpush1.msra.mxu0 %v3899_v33  ;;  %991 = vmatpush1.msra.mxu1 %v3900_v36 }
 0x17f   :  { %921 = vmatprep.subr.mxu0 %v3901_v24  ;;  %992 = vmatprep.subr.mxu1 %v3902_v16 }
 0x180   :  { %922 = vmatpush1.msra.mxu0 %v3903_v37  ;;  %993 = vmatpush1.msra.mxu1 %v3904_v4 }
 0x181   :  { %923 = vmatprep.subr.mxu0 %v3905_v26  ;;  %994 = vmatprep.subr.mxu1 %v3906_v20 }
 0x182   :  { %924 = vmatpush1.msra.mxu0 %v3907_v5  ;;  %995 = vmatpush1.msra.mxu1 %v3908_v14  ;;  %v3919_v14 = vld [vmem:[#allocation41_spill] sm:$0xff] }
 0x183   :  { %925 = vmatprep.subr.mxu0 %v3909_v23  ;;  %996 = vmatprep.subr.mxu1 %v3910_v25  ;;  %v3920_v23 = vmov 0.0   ;;  %v3921_v25 = vld [vmem:[#allocation48_spill] sm:$0xff] }
 0x184   :  { %926 = vmatpush1.msra.mxu0 %v3911_v7  ;;  %997 = vmatpush1.msra.mxu1 %v3912_v11  ;;  %v3922_v11 = vld [vmem:[#allocation21_spill] sm:$0xff] }
 0x185   :  { %927 = vmatprep.subr.mxu0 %v3913_v2  ;;  %998 = vmatprep.subr.mxu1 %v3914_v21  ;;  %v3923_v2 = vld [vmem:[#allocation22_spill] sm:$0xff] }
 0x186   :  { %928 = vmatpush1.msra.mxu0 %v3915_v19  ;;  %999 = vmatpush1.msra.mxu1 %v3916_v39 }
 0x187   :  { %929 = vmatprep.subr.mxu0 %v3917_v12  ;;  %1000 = vmatprep.subr.mxu1 %v3918_v22 }
 0x188   :  { %930 = vmatpush1.msra.mxu0 %v3919_v14  ;;  %963 = vmatprep.mubr.f32.mxu0 %v3920_v23 }
 0x189   :  { %1001 = vmatpush1.msra.mxu1 %v3921_v25  ;;  %1034 = vmatprep.mubr.f32.mxu1 %v3920_v23  ;;  %v3924_v25 = vcombine.high %v3083_v34, %v3089_v1 }
 0x18a   :  { %1099 = vmatprep.subr.mxu0 %v3922_v11  ;;  %1170 = vmatprep.subr.mxu1 %v3923_v2 }
 0x229   :  { %v765_v21 = vpop.f32.mrf.mxu0  ;;  %v836_v19 = vpop.f32.mrf.mxu1 }
 0x22b   :  { %v767_v7 = vpop.f32.mrf.mxu0  ;;  %v838_v39 = vpop.f32.mrf.mxu1 }
 0x22c   :  { %v845_v5 = vcombine.low %v765_v21, %v767_v7  ;;  %v846_v12 = vcombine.low %v836_v19, %v838_v39 }
 0x22e   :  { %v853_v22 = vrot.slane %v845_v5, %v3888_v17  ;;  %v860_v14 = vrot.slane %v846_v12, %v3888_v17  ;;  %v3934_v5 = vld [vmem:[#allocation43_spill] sm:$0xff] }
 0x230   :  { %v861_v20 = vcombine.low %v853_v22, %v860_v14  ;;  %v3935_v14 = vld [vmem:[#allocation33_spill] sm:$0xff] }
 0x232   :  { %v863_v26 = vadd.f32 %v861_v20, %v3924_v25  ;;  %v3937_v25 = vld [vmem:[#allocation35_spill] sm:$0xff] }
 0x234   :  { %v2331_v23 = vmul.f32 -1.442695, %v863_v26  ;;  %v871_v4 = vrot.slane %v863_v26, 2  ;;  %v882_v2 = vrot.slane %v863_v26, 6  ;;  %v879_v24 = vrot.slane %v863_v26, 4  ;;  %v3933_v26 = vld [vmem:[#allocation31_spill] sm:$0xff] }
 0x236   :  { %2438 = vpow2.f32 %v2331_v23  ;;  %v2332_v11 = vmul.f32 -1.442695, %v871_v4  ;;  %v2333_v37 = vmul.f32 -1.442695, %v882_v2  ;;  %v3936_v23 = vld [vmem:[#allocation44_spill] sm:$0xff] }
 0x238   :  { %2440 = vpow2.f32 %v2332_v11 }
 0x239   :  { %2442 = vpow2.f32 %v2333_v37 }
 0x243   :  { %v2439_v16 = vpop.eup %2438 }
 0x244   :  { %v867_v7 = vadd.f32 1.0, %v2439_v16 }
 0x245   :  { %v2441_v39 = vpop.eup %2440 }
 0x246   :  { %2444 = vrcp.f32 %v867_v7  ;;  %v876_v21 = vadd.f32 1.0, %v2441_v39  ;;  %v2443_v22 = vpop.eup %2442  ;;  %v3938_v7 = vld [vmem:[#allocation45_spill] sm:$0xff] }
 0x247   :  { %2446 = vtanh.f32 %v879_v24  ;;  %v887_v19 = vadd.f32 1.0, %v2443_v22  ;;  %v3932_v24 = vld [vmem:[#allocation42_spill] sm:$0xff]  ;;  %v3939_v39 = vld [vmem:[#allocation37_spill] sm:$0xff]  ;;  %v3941_v22 = vld [vmem:[#allocation39_spill] sm:$0xff] }
 0x248   :  { %2448 = vrcp.f32 %v876_v21  ;;  %v3940_v21 = vld [vmem:[#allocation46_spill] sm:$0xff] }
 0x249   :  { %2450 = vrcp.f32 %v887_v19  ;;  %v3945_v19 = vld [vmem:[#allocation48_spill] sm:$0xff] }
 0x253   :  { %v2445_v12 = vpop.eup %2444 }
 0x254   :  { %v2447_v34 = vpop.eup %2446 }
 0x255   :  { %v2449_v1 = vpop.eup %2448  ;;  %v891_v4 = vmul.f32 %v2447_v34, %v2445_v12  ;;  %v3942_v12 = vld [vmem:[#allocation47_spill] sm:$0xff]  ;;  %v3943_v34 = vld [vmem:[#allocation41_spill] sm:$0xff] }
 0x256   :  { %v890_v20 = vmul.f32 %v2449_v1, %v3124_v30  ;;  %v2451_v2 = vpop.eup %2450  ;;  %v3931_v30 = vld [vmem:[#allocation29_spill] sm:$0xff]  ;;  %v3944_v1 = vmov 0.0  }
 0x258   :  { %v3199_v11 = vadd.f32 %v891_v4, %v890_v20  ;;  %v3946_v20 = vld [vmem:[#allocation21_spill] sm:$0xff]  ;;  %v3947_v4 = vld [vmem:[#allocation22_spill] sm:$0xff] }
 0x25a   :  { %2452 = vtanh.f32 %v3199_v11 }
 0x267   :  { %v2453_v16 = vpop.eup %2452 }
 0x268   :  { %v894_v37 = vmul.f32 %v2453_v16, %v2451_v2 }
 0x26a   :  { %896 = vst [vmem:[#allocation5 + $0x2] sm:$0x3] %v894_v37  ;;  %964 = vmatmul.mubr.f32.vlgmr.msra.gmra.mxu0 %v894_v37  ;;  %1035 = vmatmul.mubr.f32.vlgmr.msra.gmra.mxu1 %v894_v37 }
 0x26b   :  { %1100 = vmatpush1.msra.mxu0 %v2806_v27  ;;  %1171 = vmatpush1.msra.mxu1 %v2841_v44  ;;  %v3925_v27 = vld [vmem:[#allocation26_spill] sm:$0xff] }
 0x26c   :  { %1101 = vmatprep.subr.mxu0 %v2809_v28  ;;  %1172 = vmatprep.subr.mxu1 %v2844_v45  ;;  %v3926_v28 = vld [vmem:[#allocation36_spill] sm:$0xff] }
 0x26d   :  { %1102 = vmatpush1.msra.mxu0 %v2811_v29  ;;  %1173 = vmatpush1.msra.mxu1 %v2850_v47  ;;  %v3927_v29 = vld [vmem:[#allocation27_spill] sm:$0xff] }
 0x26e   :  { %1103 = vmatprep.subr.mxu0 %v2817_v35  ;;  %1174 = vmatprep.subr.mxu1 %v2857_v49  ;;  %v3928_v35 = vld [vmem:[#allocation38_spill] sm:$0xff] }
 0x26f   :  { %1104 = vmatpush1.msra.mxu0 %v2821_v38  ;;  %1175 = vmatpush1.msra.mxu1 %v2860_v50  ;;  %v3929_v38 = vld [vmem:[#allocation28_spill] sm:$0xff] }
 0x270   :  { %1105 = vmatprep.subr.mxu0 %v2828_v40  ;;  %1176 = vmatprep.subr.mxu1 %v2866_v52  ;;  %v3930_v40 = vld [vmem:[#allocation40_spill] sm:$0xff] }
 0x271   :  { %1106 = vmatpush1.msra.mxu0 %v2831_v41  ;;  %1177 = vmatpush1.msra.mxu1 %v2873_v54 }
 0x272   :  { %1107 = vmatprep.subr.mxu0 %v2835_v42  ;;  %1178 = vmatprep.subr.mxu1 %v2878_v56 }
 0x273   :  { %1108 = vmatpush1.msra.mxu0 %v2839_v43  ;;  %1179 = vmatpush1.msra.mxu1 %v2884_v58 }
 0x274   :  { %1109 = vmatprep.subr.mxu0 %v2847_v46  ;;  %1180 = vmatprep.subr.mxu1 %v2890_v60 }
 0x275   :  { %1110 = vmatpush1.msra.mxu0 %v2853_v48  ;;  %1181 = vmatpush1.msra.mxu1 %v2896_v62 }
 0x276   :  { %1111 = vmatprep.subr.mxu0 %v2863_v51  ;;  %1182 = vmatprep.subr.mxu1 %v2902_v0 }
 0x277   :  { %1112 = vmatpush1.msra.mxu0 %v2869_v53  ;;  %1183 = vmatpush1.msra.mxu1 %v2908_v3 }
 0x278   :  { %1113 = vmatprep.subr.mxu0 %v2875_v55  ;;  %1184 = vmatprep.subr.mxu1 %v2914_v6 }
 0x279   :  { %1114 = vmatpush1.msra.mxu0 %v2881_v57  ;;  %1185 = vmatpush1.msra.mxu1 %v2920_v8 }
 0x27a   :  { %1115 = vmatprep.subr.mxu0 %v2887_v59  ;;  %1186 = vmatprep.subr.mxu1 %v2926_v10 }
 0x27b   :  { %1116 = vmatpush1.msra.mxu0 %v2893_v61  ;;  %1187 = vmatpush1.msra.mxu1 %v2932_v13 }
 0x27c   :  { %1117 = vmatprep.subr.mxu0 %v2899_v63  ;;  %1188 = vmatprep.subr.mxu1 %v2938_v15 }
 0x27d   :  { %1118 = vmatpush1.msra.mxu0 %v3895_v18  ;;  %1189 = vmatpush1.msra.mxu1 %v3896_v9 }
 0x27e   :  { %1119 = vmatprep.subr.mxu0 %v3897_v31  ;;  %1190 = vmatprep.subr.mxu1 %v3898_v32 }
 0x27f   :  { %1120 = vmatpush1.msra.mxu0 %v3899_v33  ;;  %1191 = vmatpush1.msra.mxu1 %v3900_v36 }
 0x280   :  { %1121 = vmatprep.subr.mxu0 %v3925_v27  ;;  %1192 = vmatprep.subr.mxu1 %v3926_v28 }
 0x281   :  { %1122 = vmatpush1.msra.mxu0 %v3927_v29  ;;  %1193 = vmatpush1.msra.mxu1 %v3928_v35 }
 0x282   :  { %1123 = vmatprep.subr.mxu0 %v3929_v38  ;;  %1194 = vmatprep.subr.mxu1 %v3930_v40 }
 0x283   :  { %1124 = vmatpush1.msra.mxu0 %v3931_v30  ;;  %1195 = vmatpush1.msra.mxu1 %v3932_v24 }
 0x284   :  { %1125 = vmatprep.subr.mxu0 %v3933_v26  ;;  %1196 = vmatprep.subr.mxu1 %v3934_v5 }
 0x285   :  { %1126 = vmatpush1.msra.mxu0 %v3935_v14  ;;  %1197 = vmatpush1.msra.mxu1 %v3936_v23  ;;  %v3949_v23 = vld [vmem:[#allocation20_spill] sm:$0xff] }
 0x286   :  { %1127 = vmatprep.subr.mxu0 %v3937_v25  ;;  %1198 = vmatprep.subr.mxu1 %v3938_v7  ;;  %v3948_v25 = vld [vmem:[#allocation19_spill] sm:$0xff] }
 0x287   :  { %1128 = vmatpush1.msra.mxu0 %v3939_v39  ;;  %1199 = vmatpush1.msra.mxu1 %v3940_v21 }
 0x288   :  { %1129 = vmatprep.subr.mxu0 %v3941_v22  ;;  %1200 = vmatprep.subr.mxu1 %v3942_v12 }
 0x289   :  { %1130 = vmatpush1.msra.mxu0 %v3943_v34  ;;  %1163 = vmatprep.mubr.f32.mxu0 %v3944_v1 }
 0x28a   :  { %1201 = vmatpush1.msra.mxu1 %v3945_v19  ;;  %1234 = vmatprep.mubr.f32.mxu1 %v3944_v1  ;;  %v3950_v19 = vcombine.low %v3948_v25, %v3949_v23 }
 0x28b   :  { %1299 = vmatprep.subr.mxu0 %v3946_v20  ;;  %1370 = vmatprep.subr.mxu1 %v3947_v4 }
 0x32a   :  { %v965_v2 = vpop.f32.mrf.mxu0  ;;  %v1036_v16 = vpop.f32.mrf.mxu1 }
 0x32c   :  { %v967_v37 = vpop.f32.mrf.mxu0  ;;  %v1038_v21 = vpop.f32.mrf.mxu1 }
 0x32d   :  { %v1045_v39 = vcombine.low %v965_v2, %v967_v37  ;;  %v1046_v22 = vcombine.low %v1036_v16, %v1038_v21  ;;  %v3281_v37 = vld [vmem:[#allocation11 + $0x1c8] sm:$0xff] }
 0x32f   :  { %v1053_v12 = vrot.slane %v1045_v39, %v3888_v17  ;;  %v1060_v34 = vrot.slane %v1046_v22, %v3888_v17 }
 0x331   :  { %v1061_v7 = vcombine.low %v1053_v12, %v1060_v34 }
 0x333   :  { %v1063_v14 = vadd.f32 %v1061_v7, %v3950_v19 }
 0x335   :  { %v2334_v1 = vmul.f32 -1.442695, %v1063_v14  ;;  %v1071_v5 = vrot.slane %v1063_v14, 2  ;;  %v1082_v4 = vrot.slane %v1063_v14, 6  ;;  %v1079_v30 = vrot.slane %v1063_v14, 4 }
 0x337   :  { %2454 = vpow2.f32 %v2334_v1  ;;  %v2335_v20 = vmul.f32 -1.442695, %v1071_v5  ;;  %v2336_v26 = vmul.f32 -1.442695, %v1082_v4  ;;  %v3293_v4 = vld [vmem:[#allocation11 + $0x1a0] sm:$0xff] }
 0x339   :  { %2456 = vpow2.f32 %v2335_v20  ;;  %v3289_v20 = vld [vmem:[#allocation11 + $0x1a8] sm:$0xff] }
 0x33a   :  { %2458 = vpow2.f32 %v2336_v26 }
 0x344   :  { %v2455_v24 = vpop.eup %2454 }
 0x345   :  { %v1067_v2 = vadd.f32 1.0, %v2455_v24 }
 0x346   :  { %v2457_v21 = vpop.eup %2456 }
 0x347   :  { %2460 = vrcp.f32 %v1067_v2  ;;  %v1076_v39 = vadd.f32 1.0, %v2457_v21  ;;  %v2459_v22 = vpop.eup %2458 }
 0x348   :  { %2462 = vtanh.f32 %v1079_v30  ;;  %v1087_v19 = vadd.f32 1.0, %v2459_v22  ;;  %v3277_v30 = vld [vmem:[#allocation11 + $0x1e0] sm:$0xff] }
 0x349   :  { %2464 = vrcp.f32 %v1076_v39 }
 0x34a   :  { %2466 = vrcp.f32 %v1087_v19  ;;  %v3373_v19 = vld [vmem:[#allocation11 + $0x1d8] sm:$0xff] }
 0x354   :  { %v2461_v12 = vpop.eup %2460 }
 0x355   :  { %v2463_v34 = vpop.eup %2462 }
 0x356   :  { %v2465_v7 = vpop.eup %2464  ;;  %v1091_v5 = vmul.f32 %v2463_v34, %v2461_v12 }
 0x357   :  { %v1090_v1 = vmul.f32 %v2465_v7, %v3199_v11  ;;  %v2467_v24 = vpop.eup %2466  ;;  %v3285_v11 = vld [vmem:[#allocation11 + $0x1c0] sm:$0xff]  ;;  %v3369_v7 = vld [vmem:[#allocation11 + $0x1f0] sm:$0xff] }
 0x359   :  { %v3274_v16 = vadd.f32 %v1091_v5, %v1090_v1  ;;  %v3377_v1 = vld [vmem:[#allocation11 + $0x1d0] sm:$0xff]  ;;  %v3381_v5 = vld [vmem:[#allocation11 + $0x1b8] sm:$0xff] }
 0x35b   :  { %2468 = vtanh.f32 %v3274_v16 }
 0x368   :  { %v2469_v14 = vpop.eup %2468 }
 0x369   :  { %v1094_v26 = vmul.f32 %v2469_v14, %v2467_v24  ;;  %v3389_v24 = vld [vmem:[#allocation11 + $0x198] sm:$0xff]  ;;  %v3392_v14 = vld [vmem:[#allocation11 + $0x180] sm:$0xff] }
 0x36b   :  { %1096 = vst [vmem:[#allocation5 + $0x4] sm:$0x3] %v1094_v26  ;;  %1164 = vmatmul.mubr.f32.vlgmr.msra.gmra.mxu0 %v1094_v26  ;;  %1235 = vmatmul.mubr.f32.vlgmr.msra.gmra.mxu1 %v1094_v26  ;;  %v3395_v26 = vld [vmem:[#allocation11 + $0x190] sm:$0xff] }
 0x36c   :  { %1300 = vmatpush1.msra.mxu0 %v3277_v30  ;;  %1371 = vmatpush1.msra.mxu1 %v2841_v44  ;;  %v3297_v44 = vld [vmem:[#allocation11 + $0x188] sm:$0xff] }
 0x36d   :  { %1301 = vmatprep.subr.mxu0 %v3281_v37  ;;  %1372 = vmatprep.subr.mxu1 %v2844_v45  ;;  %v3954_v45 = vld [vmem:[#allocation43_spill] sm:$0xff] }
 0x36e   :  { %1302 = vmatpush1.msra.mxu0 %v3285_v11  ;;  %1373 = vmatpush1.msra.mxu1 %v2850_v47  ;;  %v3956_v47 = vld [vmem:[#allocation44_spill] sm:$0xff] }
 0x36f   :  { %1303 = vmatprep.subr.mxu0 %v3289_v20  ;;  %1374 = vmatprep.subr.mxu1 %v2857_v49  ;;  %v3958_v49 = vld [vmem:[#allocation45_spill] sm:$0xff] }
 0x370   :  { %1304 = vmatpush1.msra.mxu0 %v3293_v4  ;;  %1375 = vmatpush1.msra.mxu1 %v2860_v50  ;;  %v3959_v50 = vld [vmem:[#allocation37_spill] sm:$0xff] }
 0x371   :  { %1305 = vmatprep.subr.mxu0 %v3297_v44  ;;  %1376 = vmatprep.subr.mxu1 %v2866_v52  ;;  %v3961_v52 = vld [vmem:[#allocation39_spill] sm:$0xff] }
 0x372   :  { %1306 = vmatpush1.msra.mxu0 %v2831_v41  ;;  %1377 = vmatpush1.msra.mxu1 %v2873_v54  ;;  %v3951_v41 = vld [vmem:[#allocation29_spill] sm:$0xff] }
 0x373   :  { %1307 = vmatprep.subr.mxu0 %v2835_v42  ;;  %1378 = vmatprep.subr.mxu1 %v2878_v56  ;;  %v3952_v42 = vld [vmem:[#allocation42_spill] sm:$0xff]  ;;  %v3963_v54 = vld [vmem:[#allocation41_spill] sm:$0xff]  ;;  %v3965_v56 = vld [vmem:[#allocation48_spill] sm:$0xff] }
 0x374   :  { %1308 = vmatpush1.msra.mxu0 %v2839_v43  ;;  %1379 = vmatpush1.msra.mxu1 %v2884_v58  ;;  %v3953_v43 = vld [vmem:[#allocation31_spill] sm:$0xff]  ;;  %v3356_v58 = vld [vmem:[#allocation11 + $0x1f8] sm:$0xff] }
 0x375   :  { %1309 = vmatprep.subr.mxu0 %v2847_v46  ;;  %1380 = vmatprep.subr.mxu1 %v2890_v60  ;;  %v3955_v46 = vld [vmem:[#allocation33_spill] sm:$0xff]  ;;  %3967 = vst [vmem:[#allocation30_spill] sm:$0xff] %v3356_v58 }
 0x376   :  { %1310 = vmatpush1.msra.mxu0 %v2853_v48  ;;  %1381 = vmatpush1.msra.mxu1 %v2896_v62  ;;  %v3957_v48 = vld [vmem:[#allocation35_spill] sm:$0xff] }
 0x377   :  { %1311 = vmatprep.subr.mxu0 %v2863_v51  ;;  %1382 = vmatprep.subr.mxu1 %v2902_v0  ;;  %v3960_v51 = vld [vmem:[#allocation46_spill] sm:$0xff] }
 0x378   :  { %1312 = vmatpush1.msra.mxu0 %v2869_v53  ;;  %1383 = vmatpush1.msra.mxu1 %v2908_v3  ;;  %v3962_v53 = vld [vmem:[#allocation47_spill] sm:$0xff] }
 0x379   :  { %1313 = vmatprep.subr.mxu0 %v2875_v55  ;;  %1384 = vmatprep.subr.mxu1 %v2914_v6  ;;  %v3964_v55 = vmov 0.0  }
 0x37a   :  { %1314 = vmatpush1.msra.mxu0 %v2881_v57  ;;  %1385 = vmatpush1.msra.mxu1 %v2920_v8  ;;  %v3353_v57 = vld [vmem:[#allocation11 + $0x1e8] sm:$0xff] }
 0x37b   :  { %1315 = vmatprep.subr.mxu0 %v2887_v59  ;;  %1386 = vmatprep.subr.mxu1 %v2926_v10  ;;  %3966 = vst [vmem:[#allocation23_spill] sm:$0xff] %v3353_v57  ;;  %v3968_v10 = vcombine.high %v3948_v25, %v3949_v23 }
 0x37c   :  { %1316 = vmatpush1.msra.mxu0 %v2893_v61  ;;  %1387 = vmatpush1.msra.mxu1 %v2932_v13 }
 0x37d   :  { %1317 = vmatprep.subr.mxu0 %v2899_v63  ;;  %1388 = vmatprep.subr.mxu1 %v2938_v15 }
 0x37e   :  { %1318 = vmatpush1.msra.mxu0 %v3895_v18  ;;  %1389 = vmatpush1.msra.mxu1 %v3896_v9 }
 0x37f   :  { %1319 = vmatprep.subr.mxu0 %v3897_v31  ;;  %1390 = vmatprep.subr.mxu1 %v3898_v32 }
 0x380   :  { %1320 = vmatpush1.msra.mxu0 %v3899_v33  ;;  %1391 = vmatpush1.msra.mxu1 %v3900_v36 }
 0x381   :  { %1321 = vmatprep.subr.mxu0 %v3925_v27  ;;  %1392 = vmatprep.subr.mxu1 %v3926_v28 }
 0x382   :  { %1322 = vmatpush1.msra.mxu0 %v3927_v29  ;;  %1393 = vmatpush1.msra.mxu1 %v3928_v35 }
 0x383   :  { %1323 = vmatprep.subr.mxu0 %v3929_v38  ;;  %1394 = vmatprep.subr.mxu1 %v3930_v40 }
 0x384   :  { %1324 = vmatpush1.msra.mxu0 %v3951_v41  ;;  %1395 = vmatpush1.msra.mxu1 %v3952_v42  ;;  %v3398_v41 = vld [vmem:[#allocation11 + $0x168] sm:$0xff]  ;;  %v3401_v42 = vld [vmem:[#allocation11 + $0x178] sm:$0xff] }
 0x385   :  { %1325 = vmatprep.subr.mxu0 %v3953_v43  ;;  %1396 = vmatprep.subr.mxu1 %v3954_v45  ;;  %v3404_v43 = vld [vmem:[#allocation11 + $0x160] sm:$0xff]  ;;  %v3407_v45 = vld [vmem:[#allocation11 + $0x170] sm:$0xff] }
 0x386   :  { %1326 = vmatpush1.msra.mxu0 %v3955_v46  ;;  %1397 = vmatpush1.msra.mxu1 %v3956_v47  ;;  %v3410_v46 = vld [vmem:[#allocation11 + $0x148] sm:$0xff]  ;;  %v3413_v47 = vld [vmem:[#allocation11 + $0x158] sm:$0xff] }
 0x387   :  { %1327 = vmatprep.subr.mxu0 %v3957_v48  ;;  %1398 = vmatprep.subr.mxu1 %v3958_v49  ;;  %v3416_v48 = vld [vmem:[#allocation11 + $0x140] sm:$0xff]  ;;  %v3419_v49 = vld [vmem:[#allocation11 + $0x150] sm:$0xff] }
 0x388   :  { %1328 = vmatpush1.msra.mxu0 %v3959_v50  ;;  %1399 = vmatpush1.msra.mxu1 %v3960_v51  ;;  %v3422_v50 = vld [vmem:[#allocation11 + $0x128] sm:$0xff]  ;;  %v3425_v51 = vld [vmem:[#allocation11 + $0x138] sm:$0xff] }
 0x389   :  { %1329 = vmatprep.subr.mxu0 %v3961_v52  ;;  %1400 = vmatprep.subr.mxu1 %v3962_v53  ;;  %v3428_v52 = vld [vmem:[#allocation11 + $0x120] sm:$0xff]  ;;  %v3431_v53 = vld [vmem:[#allocation11 + $0x130] sm:$0xff] }
 0x38a   :  { %1330 = vmatpush1.msra.mxu0 %v3963_v54  ;;  %1363 = vmatprep.mubr.f32.mxu0 %v3964_v55  ;;  %v3434_v54 = vld [vmem:[#allocation11 + $0x108] sm:$0xff] }
 0x38b   :  { %1401 = vmatpush1.msra.mxu1 %v3965_v56  ;;  %1434 = vmatprep.mubr.f32.mxu1 %v3964_v55  ;;  %v3437_v56 = vld [vmem:[#allocation11 + $0x118] sm:$0xff] }
 0x38c   :  { %1499 = vmatprep.subr.mxu0 %v3353_v57  ;;  %1570 = vmatprep.subr.mxu1 %v3356_v58 }
 0x42b   :  { %v1165_v59 = vpop.f32.mrf.mxu0  ;;  %v1236_v60 = vpop.f32.mrf.mxu1 }
 0x42d   :  { %v1167_v61 = vpop.f32.mrf.mxu0  ;;  %v1238_v62 = vpop.f32.mrf.mxu1 }
 0x42e   :  { %v1245_v63 = vcombine.low %v1165_v59, %v1167_v61  ;;  %v1246_v0 = vcombine.low %v1236_v60, %v1238_v62  ;;  %v3440_v59 = vld [vmem:[#allocation11 + $0x100] sm:$0xff]  ;;  %v3443_v60 = vld [vmem:[#allocation11 + $0x110] sm:$0xff]  ;;  %v3446_v61 = vld [vmem:[#allocation11 + $0xe8] sm:$0xff] }
 0x42f   :  { %v3449_v62 = vld [vmem:[#allocation11 + $0xf8] sm:$0xff] }
 0x430   :  { %v1253_v3 = vrot.slane %v1245_v63, %v3888_v17  ;;  %v1260_v6 = vrot.slane %v1246_v0, %v3888_v17  ;;  %v3452_v63 = vld [vmem:[#allocation11 + $0xe0] sm:$0xff]  ;;  %v3455_v0 = vld [vmem:[#allocation11 + $0xf0] sm:$0xff] }
 0x432   :  { %v1261_v8 = vcombine.low %v1253_v3, %v1260_v6  ;;  %v3458_v3 = vld [vmem:[#allocation11 + $0xc8] sm:$0xff]  ;;  %v3461_v6 = vld [vmem:[#allocation11 + $0xd8] sm:$0xff] }
 0x434   :  { %v1263_v13 = vadd.f32 %v1261_v8, %v3968_v10  ;;  %v3464_v8 = vld [vmem:[#allocation11 + $0xc0] sm:$0xff]  ;;  %v3467_v10 = vld [vmem:[#allocation11 + $0xd0] sm:$0xff] }
 0x436   :  { %v2337_v15 = vmul.f32 -1.442695, %v1263_v13  ;;  %v1271_v18 = vrot.slane %v1263_v13, 2  ;;  %v1282_v31 = vrot.slane %v1263_v13, 6  ;;  %v1279_v36 = vrot.slane %v1263_v13, 4  ;;  %v3470_v13 = vld [vmem:[#allocation11 + $0xa8] sm:$0xff] }
 0x438   :  { %2470 = vpow2.f32 %v2337_v15  ;;  %v2338_v9 = vmul.f32 -1.442695, %v1271_v18  ;;  %v2339_v32 = vmul.f32 -1.442695, %v1282_v31  ;;  %v3473_v15 = vld [vmem:[#allocation11 + $0xb8] sm:$0xff]  ;;  %v3476_v18 = vld [vmem:[#allocation11 + $0xa0] sm:$0xff] }
 0x439   :  { %v3482_v31 = vld [vmem:[#allocation11 + $0x88] sm:$0xff] }
 0x43a   :  { %2472 = vpow2.f32 %v2338_v9  ;;  %v3479_v9 = vld [vmem:[#allocation11 + $0xb0] sm:$0xff]  ;;  %3969 = vst [vmem:[#allocation24_spill] sm:$0xff] %v3482_v31 }
 0x43b   :  { %2474 = vpow2.f32 %v2339_v32  ;;  %v3485_v32 = vld [vmem:[#allocation11 + $0x98] sm:$0xff] }
 0x43c   :  { %3970 = vst [vmem:[#allocation32_spill] sm:$0xff] %v3485_v32 }
 0x445   :  { %v2471_v33 = vpop.eup %2470 }
 0x446   :  { %v1267_v27 = vadd.f32 1.0, %v2471_v33  ;;  %v3488_v33 = vld [vmem:[#allocation11 + $0x80] sm:$0xff] }
 0x447   :  { %v2473_v28 = vpop.eup %2472  ;;  %3971 = vst [vmem:[#allocation25_spill] sm:$0xff] %v3488_v33 }
 0x448   :  { %2476 = vrcp.f32 %v1267_v27  ;;  %v1276_v29 = vadd.f32 1.0, %v2473_v28  ;;  %v2475_v35 = vpop.eup %2474  ;;  %v3494_v27 = vld [vmem:[#allocation11 + $0x68] sm:$0xff]  ;;  %v3497_v28 = vld [vmem:[#allocation11 + $0x78] sm:$0xff] }
 0x449   :  { %2478 = vtanh.f32 %v1279_v36  ;;  %v1287_v25 = vadd.f32 1.0, %v2475_v35  ;;  %v3491_v36 = vld [vmem:[#allocation11 + $0x90] sm:$0xff]  ;;  %3973 = vst [vmem:[#allocation26_spill] sm:$0xff] %v3494_v27  ;;  %3974 = vst [vmem:[#allocation36_spill] sm:$0xff] %v3497_v28 }
 0x44a   :  { %2480 = vrcp.f32 %v1276_v29  ;;  %3972 = vst [vmem:[#allocation34_spill] sm:$0xff] %v3491_v36  ;;  %v3500_v29 = vld [vmem:[#allocation11 + $0x60] sm:$0xff]  ;;  %v3503_v35 = vld [vmem:[#allocation11 + $0x70] sm:$0xff] }
 0x44b   :  { %2482 = vrcp.f32 %v1287_v25  ;;  %3975 = vst [vmem:[#allocation27_spill] sm:$0xff] %v3500_v29  ;;  %3976 = vst [vmem:[#allocation38_spill] sm:$0xff] %v3503_v35  ;;  %v3515_v25 = vld [vmem:[#allocation11 + $0x50] sm:$0xff] }
 0x44c   :  { %3980 = vst [vmem:[#allocation22_spill] sm:$0xff] %v3515_v25 }
 0x455   :  { %v2477_v38 = vpop.eup %2476 }
 0x456   :  { %v2479_v40 = vpop.eup %2478 }
 0x457   :  { %v2481_v23 = vpop.eup %2480  ;;  %v1291_v21 = vmul.f32 %v2479_v40, %v2477_v38  ;;  %v3506_v38 = vld [vmem:[#allocation11 + $0x48] sm:$0xff]  ;;  %v3509_v40 = vld [vmem:[#allocation11 + $0x58] sm:$0xff] }
 0x458   :  { %v1290_v2 = vmul.f32 %v2481_v23, %v3274_v16  ;;  %v2483_v22 = vpop.eup %2482  ;;  %v3385_v16 = vld [vmem:[#allocation11 + $0x1b0] sm:$0xff]  ;;  %3977 = vst [vmem:[#allocation28_spill] sm:$0xff] %v3506_v38  ;;  %3978 = vst [vmem:[#allocation40_spill] sm:$0xff] %v3509_v40  ;;  %v3512_v23 = vld [vmem:[#allocation11 + $0x40] sm:$0xff] }
 0x459   :  { %3979 = vst [vmem:[#allocation21_spill] sm:$0xff] %v3512_v23 }
 0x45a   :  { %v3365_v39 = vadd.f32 %v1291_v21, %v1290_v2  ;;  %v3518_v2 = vld [vmem:[#allocation11 + $0x28] sm:$0xff]  ;;  %v3521_v21 = vld [vmem:[#allocation11 + $0x38] sm:$0xff] }
 0x45b   :  { %3981 = vst [vmem:[#allocation19_spill] sm:$0xff] %v3518_v2  ;;  %3982 = vst [vmem:[#allocation20_spill] sm:$0xff] %v3521_v21 }
 0x45c   :  { %2484 = vtanh.f32 %v3365_v39 }
 0x469   :  { %v2485_v12 = vpop.eup %2484 }
 0x46a   :  { %v1294_v34 = vmul.f32 %v2485_v12, %v2483_v22  ;;  %v3524_v22 = vld [vmem:[#allocation11 + $0x20] sm:$0xff]  ;;  %v3527_v12 = vld [vmem:[#allocation11 + $0x30] sm:$0xff] }
 0x46b   :  { %3983 = vst [vmem:[#allocation29_spill] sm:$0xff] %v3524_v22  ;;  %3984 = vst [vmem:[#allocation42_spill] sm:$0xff] %v3527_v12 }
 0x46c   :  { %1296 = vst [vmem:[#allocation5 + $0x6] sm:$0x3] %v1294_v34  ;;  %1364 = vmatmul.mubr.f32.vlgmr.msra.gmra.mxu0 %v1294_v34  ;;  %1435 = vmatmul.mubr.f32.vlgmr.msra.gmra.mxu1 %v1294_v34  ;;  %v3530_v34 = vld [vmem:[#allocation11 + $0x8] sm:$0xff] }
 0x46d   :  { %1500 = vmatpush1.msra.mxu0 %v3277_v30  ;;  %1571 = vmatpush1.msra.mxu1 %v3369_v7  ;;  %3985 = vst [vmem:[#allocation31_spill] sm:$0xff] %v3530_v34 }
 0x46e   :  { %1501 = vmatprep.subr.mxu0 %v3281_v37  ;;  %1572 = vmatprep.subr.mxu1 %v3373_v19 }
 0x46f   :  { %1502 = vmatpush1.msra.mxu0 %v3285_v11  ;;  %1573 = vmatpush1.msra.mxu1 %v3377_v1 }
 0x470   :  { %1503 = vmatprep.subr.mxu0 %v3289_v20  ;;  %1574 = vmatprep.subr.mxu1 %v3381_v5 }
 0x471   :  { %1504 = vmatpush1.msra.mxu0 %v3293_v4  ;;  %1575 = vmatpush1.msra.mxu1 %v3385_v16 }
 0x472   :  { %1505 = vmatprep.subr.mxu0 %v3297_v44  ;;  %1576 = vmatprep.subr.mxu1 %v3389_v24 }
 0x473   :  { %1506 = vmatpush1.msra.mxu0 %v3392_v14  ;;  %1577 = vmatpush1.msra.mxu1 %v3395_v26 }
 0x474   :  { %1507 = vmatprep.subr.mxu0 %v3398_v41  ;;  %1578 = vmatprep.subr.mxu1 %v3401_v42 }
 0x475   :  { %1508 = vmatpush1.msra.mxu0 %v3404_v43  ;;  %1579 = vmatpush1.msra.mxu1 %v3407_v45 }
 0x476   :  { %1509 = vmatprep.subr.mxu0 %v3410_v46  ;;  %1580 = vmatprep.subr.mxu1 %v3413_v47 }
 0x477   :  { %1510 = vmatpush1.msra.mxu0 %v3416_v48  ;;  %1581 = vmatpush1.msra.mxu1 %v3419_v49 }
 0x478   :  { %1511 = vmatprep.subr.mxu0 %v3422_v50  ;;  %1582 = vmatprep.subr.mxu1 %v3425_v51 }
 0x479   :  { %1512 = vmatpush1.msra.mxu0 %v3428_v52  ;;  %1583 = vmatpush1.msra.mxu1 %v3431_v53 }
 0x47a   :  { %1513 = vmatprep.subr.mxu0 %v3434_v54  ;;  %1584 = vmatprep.subr.mxu1 %v3437_v56 }
 0x47b   :  { %1514 = vmatpush1.msra.mxu0 %v3440_v59  ;;  %1585 = vmatpush1.msra.mxu1 %v3443_v60 }
 0x47c   :  { %1515 = vmatprep.subr.mxu0 %v3446_v61  ;;  %1586 = vmatprep.subr.mxu1 %v3449_v62 }
 0x47d   :  { %1516 = vmatpush1.msra.mxu0 %v3452_v63  ;;  %1587 = vmatpush1.msra.mxu1 %v3455_v0 }
 0x47e   :  { %1517 = vmatprep.subr.mxu0 %v3458_v3  ;;  %1588 = vmatprep.subr.mxu1 %v3461_v6 }
 0x47f   :  { %1518 = vmatpush1.msra.mxu0 %v3464_v8  ;;  %1589 = vmatpush1.msra.mxu1 %v3467_v10 }
 0x480   :  { %1519 = vmatprep.subr.mxu0 %v3470_v13  ;;  %1590 = vmatprep.subr.mxu1 %v3473_v15 }
 0x481   :  { %1520 = vmatpush1.msra.mxu0 %v3476_v18  ;;  %1591 = vmatpush1.msra.mxu1 %v3479_v9 }
 0x482   :  { %1521 = vmatprep.subr.mxu0 %v3482_v31  ;;  %1592 = vmatprep.subr.mxu1 %v3485_v32 }
 0x483   :  { %1522 = vmatpush1.msra.mxu0 %v3488_v33  ;;  %1593 = vmatpush1.msra.mxu1 %v3491_v36 }
 0x484   :  { %1523 = vmatprep.subr.mxu0 %v3494_v27  ;;  %1594 = vmatprep.subr.mxu1 %v3497_v28  ;;  %v3990_v28 = vld [vmem:[#allocation51_spill] sm:$0xff] }
 0x485   :  { %1524 = vmatpush1.msra.mxu0 %v3500_v29  ;;  %1595 = vmatpush1.msra.mxu1 %v3503_v35  ;;  %v3989_v29 = vld [vmem:[#allocation49_spill] sm:$0xff] }
 0x486   :  { %1525 = vmatprep.subr.mxu0 %v3506_v38  ;;  %1596 = vmatprep.subr.mxu1 %v3509_v40 }
 0x487   :  { %1526 = vmatpush1.msra.mxu0 %v3512_v23  ;;  %1597 = vmatpush1.msra.mxu1 %v3515_v25  ;;  %v3533_v25 = vld [vmem:[#allocation11 + $0x18] sm:$0xff] }
 0x488   :  { %1527 = vmatprep.subr.mxu0 %v3518_v2  ;;  %1598 = vmatprep.subr.mxu1 %v3521_v21  ;;  %3986 = vst [vmem:[#allocation43_spill] sm:$0xff] %v3533_v25  ;;  %v3536_v2 = vld [vmem:[#allocation11] sm:$0xff]  ;;  %v3540_v21 = vld [vmem:[#allocation11 + $0x10] sm:$0xff] }
 0x489   :  { %1528 = vmatpush1.msra.mxu0 %v3524_v22  ;;  %1599 = vmatpush1.msra.mxu1 %v3527_v12  ;;  %3987 = vst [vmem:[#allocation33_spill] sm:$0xff] %v3536_v2  ;;  %3988 = vst [vmem:[#allocation44_spill] sm:$0xff] %v3540_v21 }
 0x48a   :  { %1529 = vmatprep.subr.mxu0 %v3530_v34  ;;  %1600 = vmatprep.subr.mxu1 %v3533_v25 }
 0x48b   :  { %1530 = vmatpush1.msra.mxu0 %v3536_v2  ;;  %1563 = vmatprep.mubr.f32.mxu0 %v3964_v55 }
 0x48c   :  { %1601 = vmatpush1.msra.mxu1 %v3540_v21  ;;  %1634 = vmatprep.mubr.f32.mxu1 %v3964_v55  ;;  %v3991_v21 = vcombine.low %v3989_v29, %v3990_v28 }
 0x48d   :  { %1699 = vmatprep.subr.mxu0 %v3353_v57  ;;  %1770 = vmatprep.subr.mxu1 %v3356_v58 }
 0x52c   :  { %v1365_v34 = vpop.f32.mrf.mxu0  ;;  %v1436_v12 = vpop.f32.mrf.mxu1 }
 0x52e   :  { %v1367_v22 = vpop.f32.mrf.mxu0  ;;  %v1438_v25 = vpop.f32.mrf.mxu1 }
 0x52f   :  { %v1445_v23 = vcombine.low %v1365_v34, %v1367_v22  ;;  %v1446_v40 = vcombine.low %v1436_v12, %v1438_v25  ;;  %v3995_v12 = vld [vmem:[#allocation34_spill] sm:$0xff] }
 0x530   :  { %v3996_v34 = vld [vmem:[#allocation26_spill] sm:$0xff] }
 0x531   :  { %v1453_v2 = vrot.slane %v1445_v23, %v3888_v17  ;;  %v1460_v38 = vrot.slane %v1446_v40, %v3888_v17 }
 0x533   :  { %v1461_v35 = vcombine.low %v1453_v2, %v1460_v38 }
 0x535   :  { %v1463_v27 = vadd.f32 %v1461_v35, %v3991_v21 }
 0x537   :  { %v2340_v55 = vmul.f32 -1.442695, %v1463_v27  ;;  %v1471_v36 = vrot.slane %v1463_v27, 2  ;;  %v1482_v58 = vrot.slane %v1463_v27, 6  ;;  %v1479_v31 = vrot.slane %v1463_v27, 4  ;;  %v3994_v27 = vld [vmem:[#allocation25_spill] sm:$0xff] }
 0x539   :  { %2486 = vpow2.f32 %v2340_v55  ;;  %v2341_v57 = vmul.f32 -1.442695, %v1471_v36  ;;  %v2342_v33 = vmul.f32 -1.442695, %v1482_v58 }
 0x53b   :  { %2488 = vpow2.f32 %v2341_v57 }
 0x53c   :  { %2490 = vpow2.f32 %v2342_v33 }
 0x546   :  { %v2487_v32 = vpop.eup %2486 }
 0x547   :  { %v1467_v22 = vadd.f32 1.0, %v2487_v32 }
 0x548   :  { %v2489_v25 = vpop.eup %2488 }
 0x549   :  { %2492 = vrcp.f32 %v1467_v22  ;;  %v1476_v23 = vadd.f32 1.0, %v2489_v25  ;;  %v2491_v38 = vpop.eup %2490  ;;  %v3997_v22 = vld [vmem:[#allocation36_spill] sm:$0xff]  ;;  %v3998_v25 = vld [vmem:[#allocation27_spill] sm:$0xff] }
 0x54a   :  { %2494 = vtanh.f32 %v1479_v31  ;;  %v1487_v21 = vadd.f32 1.0, %v2491_v38  ;;  %v3993_v31 = vld [vmem:[#allocation32_spill] sm:$0xff] }
 0x54b   :  { %2496 = vrcp.f32 %v1476_v23  ;;  %v3999_v23 = vld [vmem:[#allocation38_spill] sm:$0xff]  ;;  %v4000_v38 = vld [vmem:[#allocation28_spill] sm:$0xff] }
 0x54c   :  { %2498 = vrcp.f32 %v1487_v21  ;;  %v4004_v21 = vld [vmem:[#allocation19_spill] sm:$0xff] }
 0x556   :  { %v2493_v40 = vpop.eup %2492 }
 0x557   :  { %v2495_v2 = vpop.eup %2494 }
 0x558   :  { %v2497_v35 = vpop.eup %2496  ;;  %v1491_v36 = vmul.f32 %v2495_v2, %v2493_v40  ;;  %v4001_v40 = vld [vmem:[#allocation40_spill] sm:$0xff]  ;;  %v4002_v2 = vld [vmem:[#allocation21_spill] sm:$0xff] }
 0x559   :  { %v1490_v55 = vmul.f32 %v2497_v35, %v3365_v39  ;;  %v2499_v58 = vpop.eup %2498  ;;  %v3992_v39 = vld [vmem:[#allocation24_spill] sm:$0xff]  ;;  %v4003_v35 = vld [vmem:[#allocation22_spill] sm:$0xff] }
 0x55b   :  { %v3552_v57 = vadd.f32 %v1491_v36, %v1490_v55  ;;  %v4005_v55 = vld [vmem:[#allocation20_spill] sm:$0xff]  ;;  %v4006_v36 = vld [vmem:[#allocation29_spill] sm:$0xff] }
 0x55d   :  { %2500 = vtanh.f32 %v3552_v57 }
 0x56a   :  { %v2501_v32 = vpop.eup %2500 }
 0x56b   :  { %v1494_v33 = vmul.f32 %v2501_v32, %v2499_v58  ;;  %v4007_v58 = vld [vmem:[#allocation42_spill] sm:$0xff]  ;;  %v4008_v32 = vld [vmem:[#allocation31_spill] sm:$0xff] }
 0x56d   :  { %1496 = vst [vmem:[#allocation5 + $0x8] sm:$0x3] %v1494_v33  ;;  %1564 = vmatmul.mubr.f32.vlgmr.msra.gmra.mxu0 %v1494_v33  ;;  %1635 = vmatmul.mubr.f32.vlgmr.msra.gmra.mxu1 %v1494_v33  ;;  %v4009_v33 = vld [vmem:[#allocation43_spill] sm:$0xff] }
 0x56e   :  { %1700 = vmatpush1.msra.mxu0 %v3277_v30  ;;  %1771 = vmatpush1.msra.mxu1 %v3369_v7 }
 0x56f   :  { %1701 = vmatprep.subr.mxu0 %v3281_v37  ;;  %1772 = vmatprep.subr.mxu1 %v3373_v19 }
 0x570   :  { %1702 = vmatpush1.msra.mxu0 %v3285_v11  ;;  %1773 = vmatpush1.msra.mxu1 %v3377_v1 }
 0x571   :  { %1703 = vmatprep.subr.mxu0 %v3289_v20  ;;  %1774 = vmatprep.subr.mxu1 %v3381_v5 }
 0x572   :  { %1704 = vmatpush1.msra.mxu0 %v3293_v4  ;;  %1775 = vmatpush1.msra.mxu1 %v3385_v16 }
 0x573   :  { %1705 = vmatprep.subr.mxu0 %v3297_v44  ;;  %1776 = vmatprep.subr.mxu1 %v3389_v24 }
 0x574   :  { %1706 = vmatpush1.msra.mxu0 %v3392_v14  ;;  %1777 = vmatpush1.msra.mxu1 %v3395_v26 }
 0x575   :  { %1707 = vmatprep.subr.mxu0 %v3398_v41  ;;  %1778 = vmatprep.subr.mxu1 %v3401_v42 }
 0x576   :  { %1708 = vmatpush1.msra.mxu0 %v3404_v43  ;;  %1779 = vmatpush1.msra.mxu1 %v3407_v45 }
 0x577   :  { %1709 = vmatprep.subr.mxu0 %v3410_v46  ;;  %1780 = vmatprep.subr.mxu1 %v3413_v47 }
 0x578   :  { %1710 = vmatpush1.msra.mxu0 %v3416_v48  ;;  %1781 = vmatpush1.msra.mxu1 %v3419_v49 }
 0x579   :  { %1711 = vmatprep.subr.mxu0 %v3422_v50  ;;  %1782 = vmatprep.subr.mxu1 %v3425_v51 }
 0x57a   :  { %1712 = vmatpush1.msra.mxu0 %v3428_v52  ;;  %1783 = vmatpush1.msra.mxu1 %v3431_v53 }
 0x57b   :  { %1713 = vmatprep.subr.mxu0 %v3434_v54  ;;  %1784 = vmatprep.subr.mxu1 %v3437_v56 }
 0x57c   :  { %1714 = vmatpush1.msra.mxu0 %v3440_v59  ;;  %1785 = vmatpush1.msra.mxu1 %v3443_v60 }
 0x57d   :  { %1715 = vmatprep.subr.mxu0 %v3446_v61  ;;  %1786 = vmatprep.subr.mxu1 %v3449_v62 }
 0x57e   :  { %1716 = vmatpush1.msra.mxu0 %v3452_v63  ;;  %1787 = vmatpush1.msra.mxu1 %v3455_v0 }
 0x57f   :  { %1717 = vmatprep.subr.mxu0 %v3458_v3  ;;  %1788 = vmatprep.subr.mxu1 %v3461_v6 }
 0x580   :  { %1718 = vmatpush1.msra.mxu0 %v3464_v8  ;;  %1789 = vmatpush1.msra.mxu1 %v3467_v10 }
 0x581   :  { %1719 = vmatprep.subr.mxu0 %v3470_v13  ;;  %1790 = vmatprep.subr.mxu1 %v3473_v15 }
 0x582   :  { %1720 = vmatpush1.msra.mxu0 %v3476_v18  ;;  %1791 = vmatpush1.msra.mxu1 %v3479_v9 }
 0x583   :  { %1721 = vmatprep.subr.mxu0 %v3992_v39  ;;  %1792 = vmatprep.subr.mxu1 %v3993_v31 }
 0x584   :  { %1722 = vmatpush1.msra.mxu0 %v3994_v27  ;;  %1793 = vmatpush1.msra.mxu1 %v3995_v12 }
 0x585   :  { %1723 = vmatprep.subr.mxu0 %v3996_v34  ;;  %1794 = vmatprep.subr.mxu1 %v3997_v22 }
 0x586   :  { %1724 = vmatpush1.msra.mxu0 %v3998_v25  ;;  %1795 = vmatpush1.msra.mxu1 %v3999_v23  ;;  %v4010_v23 = vld [vmem:[#allocation33_spill] sm:$0xff] }
 0x587   :  { %1725 = vmatprep.subr.mxu0 %v4000_v38  ;;  %1796 = vmatprep.subr.mxu1 %v4001_v40  ;;  %v4011_v38 = vmov 0.0   ;;  %v4012_v40 = vld [vmem:[#allocation44_spill] sm:$0xff] }
 0x588   :  { %1726 = vmatpush1.msra.mxu0 %v4002_v2  ;;  %1797 = vmatpush1.msra.mxu1 %v4003_v35  ;;  %v4013_v35 = vld [vmem:[#allocation23_spill] sm:$0xff] }
 0x589   :  { %1727 = vmatprep.subr.mxu0 %v4004_v21  ;;  %1798 = vmatprep.subr.mxu1 %v4005_v55  ;;  %v4014_v21 = vld [vmem:[#allocation30_spill] sm:$0xff] }
 0x58a   :  { %1728 = vmatpush1.msra.mxu0 %v4006_v36  ;;  %1799 = vmatpush1.msra.mxu1 %v4007_v58 }
 0x58b   :  { %1729 = vmatprep.subr.mxu0 %v4008_v32  ;;  %1800 = vmatprep.subr.mxu1 %v4009_v33 }
 0x58c   :  { %1730 = vmatpush1.msra.mxu0 %v4010_v23  ;;  %1763 = vmatprep.mubr.f32.mxu0 %v4011_v38 }
 0x58d   :  { %1801 = vmatpush1.msra.mxu1 %v4012_v40  ;;  %1834 = vmatprep.mubr.f32.mxu1 %v4011_v38  ;;  %v4015_v40 = vcombine.high %v3989_v29, %v3990_v28 }
 0x58e   :  { %1899 = vmatprep.subr.mxu0 %v4013_v35  ;;  %1970 = vmatprep.subr.mxu1 %v4014_v21 }
 0x62d   :  { %v1565_v55 = vpop.f32.mrf.mxu0  ;;  %v1636_v36 = vpop.f32.mrf.mxu1 }
 0x62f   :  { %v1567_v2 = vpop.f32.mrf.mxu0  ;;  %v1638_v58 = vpop.f32.mrf.mxu1 }
 0x630   :  { %v1645_v25 = vcombine.low %v1565_v55, %v1567_v2  ;;  %v1646_v32 = vcombine.low %v1636_v36, %v1638_v58 }
 0x632   :  { %v1653_v33 = vrot.slane %v1645_v25, %v3888_v17  ;;  %v1660_v23 = vrot.slane %v1646_v32, %v3888_v17 }
 0x634   :  { %v1661_v22 = vcombine.low %v1653_v33, %v1660_v23 }
 0x636   :  { %v1663_v34 = vadd.f32 %v1661_v22, %v4015_v40 }
 0x638   :  { %v2343_v38 = vmul.f32 -1.442695, %v1663_v34  ;;  %v1671_v12 = vrot.slane %v1663_v34, 2  ;;  %v1682_v21 = vrot.slane %v1663_v34, 6  ;;  %v1679_v39 = vrot.slane %v1663_v34, 4 }
 0x63a   :  { %2502 = vpow2.f32 %v2343_v38  ;;  %v2344_v35 = vmul.f32 -1.442695, %v1671_v12  ;;  %v2345_v27 = vmul.f32 -1.442695, %v1682_v21 }
 0x63c   :  { %2504 = vpow2.f32 %v2344_v35 }
 0x63d   :  { %2506 = vpow2.f32 %v2345_v27 }
 0x647   :  { %v2503_v31 = vpop.eup %2502 }
 0x648   :  { %v1667_v2 = vadd.f32 1.0, %v2503_v31 }
 0x649   :  { %v2505_v55 = vpop.eup %2504 }
 0x64a   :  { %2508 = vrcp.f32 %v1667_v2  ;;  %v1676_v25 = vadd.f32 1.0, %v2505_v55  ;;  %v2507_v23 = vpop.eup %2506 }
 0x64b   :  { %2510 = vtanh.f32 %v1679_v39  ;;  %v1687_v22 = vadd.f32 1.0, %v2507_v23  ;;  %v2102_v23 = vld [vmem:[#allocation5 + $0x6] sm:$0x3] }
 0x64c   :  { %2512 = vrcp.f32 %v1676_v25 }
 0x64d   :  { %2514 = vrcp.f32 %v1687_v22  ;;  %v2099_v22 = vld [vmem:[#allocation5] sm:$0x3] }
 0x657   :  { %v2509_v36 = vpop.eup %2508 }
 0x658   :  { %v2511_v28 = vpop.eup %2510 }
 0x659   :  { %v2513_v29 = vpop.eup %2512  ;;  %v1691_v12 = vmul.f32 %v2511_v28, %v2509_v36  ;;  %v2100_v36 = vld [vmem:[#allocation5 + $0x2] sm:$0x3]  ;;  %v2101_v28 = vld [vmem:[#allocation5 + $0x4] sm:$0x3] }
 0x65a   :  { %v1690_v38 = vmul.f32 %v2513_v29, %v3552_v57  ;;  %v2515_v31 = vpop.eup %2514  ;;  %v2139_v29 = vcombine.low %v2101_v28, %v2102_v23 }
 0x65c   :  { %v3627_v40 = vadd.f32 %v1691_v12, %v1690_v38  ;;  %v2138_v38 = vcombine.low %v2099_v22, %v2100_v36  ;;  %v2153_v12 = vrot.slane %v2139_v29, %v3888_v17 }
 0x65e   :  { %2516 = vtanh.f32 %v3627_v40 }
 0x66b   :  { %v2517_v34 = vpop.eup %2516 }
 0x66c   :  { %v1694_v27 = vmul.f32 %v2517_v34, %v2515_v31 }
 0x66e   :  { %1696 = vst [vmem:[#allocation5 + $0xa] sm:$0x3] %v1694_v27  ;;  %1764 = vmatmul.mubr.f32.vlgmr.msra.gmra.mxu0 %v1694_v27  ;;  %1835 = vmatmul.mubr.f32.vlgmr.msra.gmra.mxu1 %v1694_v27  ;;  %v2146_v27 = vrot.slane %v2138_v38, %v3888_v17 }
 0x66f   :  { %1900 = vmatpush1.msra.mxu0 %v3277_v30  ;;  %1971 = vmatpush1.msra.mxu1 %v3369_v7  ;;  %v4016_v30 = vld [vmem:[#allocation24_spill] sm:$0xff]  ;;  %v4022_v7 = vld [vmem:[#allocation27_spill] sm:$0xff] }
 0x670   :  { %1901 = vmatprep.subr.mxu0 %v3281_v37  ;;  %1972 = vmatprep.subr.mxu1 %v3373_v19  ;;  %v4017_v37 = vld [vmem:[#allocation32_spill] sm:$0xff]  ;;  %v4023_v19 = vld [vmem:[#allocation38_spill] sm:$0xff] }
 0x671   :  { %1902 = vmatpush1.msra.mxu0 %v3285_v11  ;;  %1973 = vmatpush1.msra.mxu1 %v3377_v1  ;;  %v4018_v11 = vld [vmem:[#allocation25_spill] sm:$0xff]  ;;  %v4024_v1 = vld [vmem:[#allocation28_spill] sm:$0xff] }
 0x672   :  { %1903 = vmatprep.subr.mxu0 %v3289_v20  ;;  %1974 = vmatprep.subr.mxu1 %v3381_v5  ;;  %v4019_v20 = vld [vmem:[#allocation34_spill] sm:$0xff]  ;;  %v4025_v5 = vld [vmem:[#allocation40_spill] sm:$0xff] }
 0x673   :  { %1904 = vmatpush1.msra.mxu0 %v3293_v4  ;;  %1975 = vmatpush1.msra.mxu1 %v3385_v16  ;;  %v4020_v4 = vld [vmem:[#allocation26_spill] sm:$0xff]  ;;  %v4026_v16 = vld [vmem:[#allocation21_spill] sm:$0xff] }
 0x674   :  { %1905 = vmatprep.subr.mxu0 %v3297_v44  ;;  %1976 = vmatprep.subr.mxu1 %v3389_v24  ;;  %v4021_v44 = vld [vmem:[#allocation36_spill] sm:$0xff]  ;;  %v4027_v24 = vld [vmem:[#allocation22_spill] sm:$0xff] }
 0x675   :  { %1906 = vmatpush1.msra.mxu0 %v3392_v14  ;;  %1977 = vmatpush1.msra.mxu1 %v3395_v26  ;;  %v4028_v14 = vld [vmem:[#allocation19_spill] sm:$0xff]  ;;  %v4029_v26 = vld [vmem:[#allocation20_spill] sm:$0xff] }
 0x676   :  { %1907 = vmatprep.subr.mxu0 %v3398_v41  ;;  %1978 = vmatprep.subr.mxu1 %v3401_v42  ;;  %v4030_v41 = vld [vmem:[#allocation29_spill] sm:$0xff]  ;;  %v4031_v42 = vld [vmem:[#allocation42_spill] sm:$0xff] }
 0x677   :  { %1908 = vmatpush1.msra.mxu0 %v3404_v43  ;;  %1979 = vmatpush1.msra.mxu1 %v3407_v45  ;;  %v4032_v43 = vld [vmem:[#allocation31_spill] sm:$0xff] }
 0x678   :  { %1909 = vmatprep.subr.mxu0 %v3410_v46  ;;  %1980 = vmatprep.subr.mxu1 %v3413_v47  ;;  %v4033_v45 = vld [vmem:[#allocation43_spill] sm:$0xff]  ;;  %v4034_v46 = vld [vmem:[#allocation33_spill] sm:$0xff]  ;;  %v4035_v47 = vmov 0.0  }
 0x679   :  { %1910 = vmatpush1.msra.mxu0 %v3416_v48  ;;  %1981 = vmatpush1.msra.mxu1 %v3419_v49  ;;  %v4036_v48 = vld [vmem:[#allocation44_spill] sm:$0xff] }
 0x67a   :  { %1911 = vmatprep.subr.mxu0 %v3422_v50  ;;  %1982 = vmatprep.subr.mxu1 %v3425_v51 }
 0x67b   :  { %1912 = vmatpush1.msra.mxu0 %v3428_v52  ;;  %1983 = vmatpush1.msra.mxu1 %v3431_v53 }
 0x67c   :  { %1913 = vmatprep.subr.mxu0 %v3434_v54  ;;  %1984 = vmatprep.subr.mxu1 %v3437_v56 }
 0x67d   :  { %1914 = vmatpush1.msra.mxu0 %v3440_v59  ;;  %1985 = vmatpush1.msra.mxu1 %v3443_v60 }
 0x67e   :  { %1915 = vmatprep.subr.mxu0 %v3446_v61  ;;  %1986 = vmatprep.subr.mxu1 %v3449_v62  ;;  %v4037_v61 = vld [vmem:[#allocation50_spill] sm:$0xff]  ;;  %v4038_v62 = vld [vmem:[#allocation52_spill] sm:$0xff] }
 0x67f   :  { %1916 = vmatpush1.msra.mxu0 %v3452_v63  ;;  %1987 = vmatpush1.msra.mxu1 %v3455_v0  ;;  %v4039_v63 = vcombine.low %v4037_v61, %v4038_v62 }
 0x680   :  { %1917 = vmatprep.subr.mxu0 %v3458_v3  ;;  %1988 = vmatprep.subr.mxu1 %v3461_v6 }
 0x681   :  { %1918 = vmatpush1.msra.mxu0 %v3464_v8  ;;  %1989 = vmatpush1.msra.mxu1 %v3467_v10 }
 0x682   :  { %1919 = vmatprep.subr.mxu0 %v3470_v13  ;;  %1990 = vmatprep.subr.mxu1 %v3473_v15 }
 0x683   :  { %1920 = vmatpush1.msra.mxu0 %v3476_v18  ;;  %1991 = vmatpush1.msra.mxu1 %v3479_v9 }
 0x684   :  { %1921 = vmatprep.subr.mxu0 %v4016_v30  ;;  %1992 = vmatprep.subr.mxu1 %v4017_v37  ;;  %v2122_v37 = vld [vmem:[#allocation12 + $0x78] sm:$0xff] }
 0x685   :  { %1922 = vmatpush1.msra.mxu0 %v4018_v11  ;;  %1993 = vmatpush1.msra.mxu1 %v4019_v20  ;;  %v2121_v11 = vld [vmem:[#allocation12 + $0x70] sm:$0xff]  ;;  %v2120_v20 = vld [vmem:[#allocation12 + $0x68] sm:$0xff] }
 0x686   :  { %1923 = vmatprep.subr.mxu0 %v4020_v4  ;;  %1994 = vmatprep.subr.mxu1 %v4021_v44  ;;  %v2119_v4 = vld [vmem:[#allocation12 + $0x60] sm:$0xff]  ;;  %v2118_v44 = vld [vmem:[#allocation12 + $0x58] sm:$0xff] }
 0x687   :  { %1924 = vmatpush1.msra.mxu0 %v4022_v7  ;;  %1995 = vmatpush1.msra.mxu1 %v4023_v19  ;;  %v2117_v7 = vld [vmem:[#allocation12 + $0x50] sm:$0xff]  ;;  %v2116_v19 = vld [vmem:[#allocation12 + $0x48] sm:$0xff] }
 0x688   :  { %1925 = vmatprep.subr.mxu0 %v4024_v1  ;;  %1996 = vmatprep.subr.mxu1 %v4025_v5  ;;  %v2115_v1 = vld [vmem:[#allocation12 + $0x40] sm:$0xff]  ;;  %v2114_v5 = vld [vmem:[#allocation12 + $0x38] sm:$0xff] }
 0x689   :  { %1926 = vmatpush1.msra.mxu0 %v4026_v16  ;;  %1997 = vmatpush1.msra.mxu1 %v4027_v24  ;;  %v2113_v16 = vld [vmem:[#allocation12 + $0x30] sm:$0xff]  ;;  %v2112_v24 = vld [vmem:[#allocation12 + $0x28] sm:$0xff] }
 0x68a   :  { %1927 = vmatprep.subr.mxu0 %v4028_v14  ;;  %1998 = vmatprep.subr.mxu1 %v4029_v26  ;;  %v2111_v14 = vld [vmem:[#allocation12 + $0x20] sm:$0xff]  ;;  %v2110_v26 = vld [vmem:[#allocation12 + $0x18] sm:$0xff] }
 0x68b   :  { %1928 = vmatpush1.msra.mxu0 %v4030_v41  ;;  %1999 = vmatpush1.msra.mxu1 %v4031_v42  ;;  %v2109_v41 = vld [vmem:[#allocation12 + $0x10] sm:$0xff]  ;;  %v2108_v42 = vld [vmem:[#allocation12 + $0x8] sm:$0xff] }
 0x68c   :  { %1929 = vmatprep.subr.mxu0 %v4032_v43  ;;  %2000 = vmatprep.subr.mxu1 %v4033_v45  ;;  %v2107_v43 = vld [vmem:[#allocation12] sm:$0xff] }
 0x68d   :  { %1930 = vmatpush1.msra.mxu0 %v4034_v46  ;;  %1963 = vmatprep.mubr.f32.mxu0 %v4035_v47 }
 0x68e   :  { %2001 = vmatpush1.msra.mxu1 %v4036_v48  ;;  %2034 = vmatprep.mubr.f32.mxu1 %v4035_v47 }
 0x68f   :  { %2375 = vmatprep.subr.mxu0 %v2122_v37 }
 0x72e   :  { %v1765_v49 = vpop.f32.mrf.mxu0  ;;  %v1836_v50 = vpop.f32.mrf.mxu1 }
 0x730   :  { %v1767_v51 = vpop.f32.mrf.mxu0  ;;  %v1838_v52 = vpop.f32.mrf.mxu1 }
 0x731   :  { %v1845_v53 = vcombine.low %v1765_v49, %v1767_v51  ;;  %v1846_v54 = vcombine.low %v1836_v50, %v1838_v52 }
 0x733   :  { %v1853_v56 = vrot.slane %v1845_v53, %v3888_v17  ;;  %v1860_v59 = vrot.slane %v1846_v54, %v3888_v17  ;;  %v4040_v54 = vcombine.high %v4037_v61, %v4038_v62 }
 0x735   :  { %v1861_v60 = vcombine.low %v1853_v56, %v1860_v59 }
 0x737   :  { %v1863_v0 = vadd.f32 %v1861_v60, %v4039_v63 }
 0x739   :  { %v2346_v3 = vmul.f32 -1.442695, %v1863_v0  ;;  %v1871_v6 = vrot.slane %v1863_v0, 2  ;;  %v1882_v10 = vrot.slane %v1863_v0, 6  ;;  %v1879_v18 = vrot.slane %v1863_v0, 4 }
 0x73b   :  { %2518 = vpow2.f32 %v2346_v3  ;;  %v2347_v8 = vmul.f32 -1.442695, %v1871_v6  ;;  %v2348_v13 = vmul.f32 -1.442695, %v1882_v10 }
 0x73d   :  { %2520 = vpow2.f32 %v2347_v8 }
 0x73e   :  { %2522 = vpow2.f32 %v2348_v13 }
 0x748   :  { %v2519_v15 = vpop.eup %2518 }
 0x749   :  { %v1867_v9 = vadd.f32 1.0, %v2519_v15 }
 0x74a   :  { %v2521_v57 = vpop.eup %2520 }
 0x74b   :  { %2524 = vrcp.f32 %v1867_v9  ;;  %v1876_v39 = vadd.f32 1.0, %v2521_v57  ;;  %v2523_v58 = vpop.eup %2522 }
 0x74c   :  { %2526 = vtanh.f32 %v1879_v18  ;;  %v1887_v21 = vadd.f32 1.0, %v2523_v58 }
 0x74d   :  { %2528 = vrcp.f32 %v1876_v39 }
 0x74e   :  { %2530 = vrcp.f32 %v1887_v21 }
 0x758   :  { %v2525_v32 = vpop.eup %2524 }
 0x759   :  { %v2527_v33 = vpop.eup %2526 }
 0x75a   :  { %v2529_v35 = vpop.eup %2528  ;;  %v1891_v55 = vmul.f32 %v2527_v33, %v2525_v32 }
 0x75b   :  { %v1890_v2 = vmul.f32 %v2529_v35, %v3627_v40  ;;  %v2531_v31 = vpop.eup %2530  ;;  %v2154_v40 = vcombine.low %v2146_v27, %v2153_v12  ;;  %v2352_v12 = vld [vmem:[%s3731_s5] ss:$0 sm:$0xff]  ;;  %s2694_s5 = scalar_lea.vmem %s2307_s22, 256 }
 0x75c   :  { %p2695_p6 = scmp.ne.s32.totalorder %s2307_s22, %s2694_s5  ;;  %p2700_p8 = scmp.lt.s32.totalorder %s2694_s5, %s2694_s5 }
 0x75d   :  { %v3700_v25 = vadd.f32 %v1891_v55, %v1890_v2  ;;  %v2104_v2 = vld [vmem:[#allocation5 + $0xa] sm:$0x3]  ;;  %v2103_v55 = vld [vmem:[#allocation5 + $0x8] sm:$0x3] }
 0x75e   :  { %v2155_v23 = vcombine.low %v2103_v55, %v2104_v2  ;;  %p2701_p9 = por %p2700_p8, %p2699_p7 }
 0x75f   :  { %2532 = vtanh.f32 %v3700_v25 }
 0x760   :  { %v2163_v22 = vrot.slane %v2155_v23, %v3888_v17  ;;  %p2702_p10 = pnand %p2701_p9, %p2695_p6 }
 0x76c   :  { %v2533_v34 = vpop.eup %2532 }
 0x76d   :  { %v1894_v30 = vmul.f32 %v2533_v34, %v2531_v31 }
 0x76f   :  { %1896 = vst [vmem:[#allocation5 + $0xc] sm:$0x3] %v1894_v30  ;;  %1964 = vmatmul.mubr.f32.vlgmr.msra.gmra.mxu0 %v1894_v30  ;;  %2035 = vmatmul.mubr.f32.vlgmr.msra.gmra.mxu1 %v1894_v30 }
 0x770   :  { %2407 = vmatprep.mubr.f32.mxu0 %v2154_v40  ;;  %2376 = vmatpush3.msra.mxu0 %v2122_v37 }
 0x771   :  { %2377 = vmatprep.subr.mxu0 %v2121_v11 }
 0x772   :  { %2378 = vmatpush3.msra.mxu0 %v2121_v11 }
 0x773   :  { %2379 = vmatprep.subr.mxu0 %v2120_v20 }
 0x774   :  { %2380 = vmatpush3.msra.mxu0 %v2120_v20 }
 0x775   :  { %2381 = vmatprep.subr.mxu0 %v2119_v4 }
 0x776   :  { %2382 = vmatpush3.msra.mxu0 %v2119_v4  ;;  %v2105_v36 = vld [vmem:[#allocation5 + $0xc] sm:$0x3] }
 0x777   :  { %2383 = vmatprep.subr.mxu0 %v2118_v44 }
 0x778   :  { %2384 = vmatpush3.msra.mxu0 %v2118_v44 }
 0x779   :  { %2385 = vmatprep.subr.mxu0 %v2117_v7 }
 0x77a   :  { %2386 = vmatpush3.msra.mxu0 %v2117_v7 }
 0x77b   :  { %2387 = vmatprep.subr.mxu0 %v2116_v19 }
 0x77c   :  { %2388 = vmatpush3.msra.mxu0 %v2116_v19 }
 0x77d   :  { %2389 = vmatprep.subr.mxu0 %v2115_v1 }
 0x77e   :  { %2390 = vmatpush3.msra.mxu0 %v2115_v1 }
 0x77f   :  { %2391 = vmatprep.subr.mxu0 %v2114_v5 }
 0x780   :  { %2392 = vmatpush3.msra.mxu0 %v2114_v5 }
 0x781   :  { %2393 = vmatprep.subr.mxu0 %v2113_v16 }
 0x782   :  { %2394 = vmatpush3.msra.mxu0 %v2113_v16 }
 0x783   :  { %2395 = vmatprep.subr.mxu0 %v2112_v24 }
 0x784   :  { %2396 = vmatpush3.msra.mxu0 %v2112_v24 }
 0x785   :  { %2397 = vmatprep.subr.mxu0 %v2111_v14 }
 0x786   :  { %2398 = vmatpush3.msra.mxu0 %v2111_v14 }
 0x787   :  { %2399 = vmatprep.subr.mxu0 %v2110_v26 }
 0x788   :  { %2400 = vmatpush3.msra.mxu0 %v2110_v26 }
 0x789   :  { %2401 = vmatprep.subr.mxu0 %v2109_v41 }
 0x78a   :  { %2402 = vmatpush3.msra.mxu0 %v2109_v41 }
 0x78b   :  { %2403 = vmatprep.subr.mxu0 %v2108_v42 }
 0x78c   :  { %2404 = vmatpush3.msra.mxu0 %v2108_v42 }
 0x78d   :  { %2405 = vmatprep.subr.mxu0 %v2107_v43 }
 0x78e   :  { %2406 = vmatpush3.msra.mxu0 %v2107_v43 }
 0x82f   :  { %v1965_v45 = vpop.f32.mrf.mxu0  ;;  %v2036_v46 = vpop.f32.mrf.mxu1 }
 0x831   :  { %v1967_v47 = vpop.f32.mrf.mxu0  ;;  %v2038_v48 = vpop.f32.mrf.mxu1 }
 0x832   :  { %v2045_v49 = vcombine.low %v1965_v45, %v1967_v47  ;;  %v2046_v50 = vcombine.low %v2036_v46, %v2038_v48 }
 0x834   :  { %v2053_v51 = vrot.slane %v2045_v49, %v3888_v17  ;;  %v2060_v52 = vrot.slane %v2046_v50, %v3888_v17 }
 0x836   :  { %v2061_v53 = vcombine.low %v2053_v51, %v2060_v52 }
 0x838   :  { %v2063_v56 = vadd.f32 %v2061_v53, %v4040_v54 }
 0x83a   :  { %v2349_v59 = vmul.f32 -1.442695, %v2063_v56  ;;  %v2071_v60 = vrot.slane %v2063_v56, 2  ;;  %v2082_v0 = vrot.slane %v2063_v56, 6  ;;  %v2079_v8 = vrot.slane %v2063_v56, 4 }
 0x83c   :  { %2534 = vpow2.f32 %v2349_v59  ;;  %v2350_v63 = vmul.f32 -1.442695, %v2071_v60  ;;  %v2351_v3 = vmul.f32 -1.442695, %v2082_v0 }
 0x83e   :  { %2536 = vpow2.f32 %v2350_v63 }
 0x83f   :  { %2538 = vpow2.f32 %v2351_v3 }
 0x849   :  { %v2535_v6 = vpop.eup %2534 }
 0x84a   :  { %v2067_v10 = vadd.f32 1.0, %v2535_v6 }
 0x84b   :  { %v2537_v13 = vpop.eup %2536 }
 0x84c   :  { %2540 = vrcp.f32 %v2067_v10  ;;  %v2076_v15 = vadd.f32 1.0, %v2537_v13  ;;  %v2539_v18 = vpop.eup %2538 }
 0x84d   :  { %2542 = vtanh.f32 %v2079_v8  ;;  %v2087_v57 = vadd.f32 1.0, %v2539_v18 }
 0x84e   :  { %2544 = vrcp.f32 %v2076_v15 }
 0x84f   :  { %2546 = vrcp.f32 %v2087_v57 }
 0x859   :  { %v2541_v9 = vpop.eup %2540 }
 0x85a   :  { %v2543_v61 = vpop.eup %2542 }
 0x85b   :  { %v2545_v62 = vpop.eup %2544  ;;  %v2091_v58 = vmul.f32 %v2543_v61, %v2541_v9 }
 0x85c   :  { %v2090_v39 = vmul.f32 %v2545_v62, %v3700_v25  ;;  %v2547_v33 = vpop.eup %2546 }
 0x85e   :  { %v2092_v32 = vadd.f32 %v2091_v58, %v2090_v39 }
 0x860   :  { %2548 = vtanh.f32 %v2092_v32  ;;  %2098 = vst [vmem:[#allocation3] sm:$0x3] %v2092_v32 }
 0x86d   :  { %v2549_v35 = vpop.eup %2548 }
 0x86e   :  { %v2094_v21 = vmul.f32 %v2549_v35, %v2547_v33 }
 0x870   :  { %2096 = vst [vmem:[#allocation5 + $0xe] sm:$0x3] %v2094_v21  ;;  %2097 = vst [vmem:[#allocation2] sm:$0x3] %v2094_v21 }
 0x877   :  { %v2106_v28 = vld [vmem:[#allocation5 + $0xe] sm:$0x3] }
 0x878   :  { %v2156_v29 = vcombine.low %v2105_v36, %v2106_v28 }
 0x87a   :  { %v2170_v25 = vrot.slane %v2156_v29, %v3888_v17 }
 0x87c   :  { %v2171_v38 = vcombine.low %v2163_v22, %v2170_v25 }
 0x87e   :  { %2408 = vmatmul.mubr.f32.vlgmr.msra.gmra.mxu0 %v2171_v38 }
 0x93e   :  { %v2409_v31 = vpop.f32.mrf.mxu0 }
 0x93f   :  { %v2246_v34 = vadd.f32 %v2409_v31, %v2352_v12 }
 0x940   :  { %v2240_v27 = vpop.f32.mrf.mxu0 }
 0x941   :  { %v2268_v30 = vcombine.high %v2246_v34, %v2246_v34  ;;  %v2275_v40 = vrot.slane %v2246_v34, %v3888_v17  ;;  %2355 = vst.sshfl [vmem:[#allocation14 + $0x8] sm:$0x3 pattern:$0x76325410] %v2246_v34  ;;  %v2241_v37 = vadd.f32 %v2352_v12, %v2240_v27 }
 0x943   :  { %v2282_v11 = vrot.slane %v2268_v30, %v3888_v17  ;;  %v2283_v20 = vcombine.high %v2275_v40, %v2275_v40  ;;  %2356 = vst.sshfl [vmem:[#allocation14 + $0xc] sm:$0x3 pattern:$0x76325410] %v2268_v30  ;;  %v2251_v4 = vcombine.high %v2241_v37, %v2241_v37  ;;  %v2258_v44 = vrot.slane %v2241_v37, %v3888_v17 }
 0x944   :  { %2353 = vst.sshfl [vmem:[#allocation14] sm:$0x3 pattern:$0x76325410] %v2241_v37 }
 0x945   :  { %v2284_v7 = vcombine.high %v2282_v11, %v2282_v11  ;;  %2298 = vst [vmem:[#allocation14 + $0xa] sm:$0x3] %v2283_v20  ;;  %v2265_v19 = vrot.slane %v2251_v4, %v3888_v17  ;;  %v2266_v1 = vcombine.high %v2258_v44, %v2258_v44  ;;  %2354 = vst.sshfl [vmem:[#allocation14 + $0x4] sm:$0x3 pattern:$0x76325410] %v2251_v4 }
 0x947   :  { %2300 = vst [vmem:[#allocation14 + $0xe] sm:$0x3] %v2284_v7  ;;  %v2267_v5 = vcombine.high %v2265_v19, %v2265_v19  ;;  %2294 = vst [vmem:[#allocation14 + $0x2] sm:$0x3] %v2266_v1 }
 0x949   :  { %2296 = vst [vmem:[#allocation14 + $0x6] sm:$0x3] %v2267_v5 }
 0x94a   :  { %2705 = shalt.err (!%p2702_p10)
}
 0x94b   :  { %2312 = dma.vmem_to_hbm [thread:$0]  %s2307_s22, 256, %s3732_s6, [#allocation8], %s2724_s25, %s2724_s25, %s2726_s7  }
 0x94c   :  { %2720 = dma.done.wait [#allocation8], 256  }
 0x94d   :  { %2721 = vsyncadd [#allocation8], 4294967040 }
 0x94e   :  { %2316 = vsyncpa [#allocation7], 1 }
 0x94f   :  { %2317 = vsyncpa [#allocation10], 1 }
 0x950   :  { %2318 = vsyncpa [#allocation13], 1 }
 0x951   :  { %2319 = vsyncpa [#allocation8], 1 }

</bundles_post_ra>
